<compile_context>
chip_gen: v7x
topology: tpu7x:2x2x1
jax: 0.10.0
libtpu: 0.0.40
codegen_flags: <defaults>
</compile_context>

<pallas_src>
import math

import jax
import jax.numpy as jnp
from jax.experimental import pallas as pl
from jax.experimental.pallas import tpu as pltpu  # noqa: F401  (TPU backend)

# ---- model dims (small, consistent with DecoderLayer(d_model, num_heads, d_ff)) ----
B = 2          # batch
S_T = 8        # target (decoder) sequence length
S_S = 8        # source (encoder) sequence length
D_MODEL = 32
NUM_HEADS = 4
D_K = D_MODEL // NUM_HEADS
D_FF = 64
EPS = 1e-5     # nn.LayerNorm default
NEG_INF = 1e9


# ----------------------------- in-kernel helpers -----------------------------
def _layernorm(x, g, b):
    mean = jnp.mean(x, axis=-1, keepdims=True)
    var = jnp.mean((x - mean) ** 2, axis=-1, keepdims=True)
    return (x - mean) * jax.lax.rsqrt(var + EPS) * g + b


def _attend(q, k, v, bias, wo_bf16, bo, s_q, s_k):
    """Multi-head attention core over the batch-folded row layout.

    q: (B*s_q, D) f32  (1/sqrt(d_k) already folded into the Q projection),
    k, v: (B*s_k, D) f32 with heads packed along the last (lane) dim,
    bias: (s_q, s_k) additive mask (0 / -1e9) shared across the batch,
    wo_bf16: (D, D) bf16, bo: (1, D) f32.

    Scores / PV stay per-(batch, head) (they are block-diagonal in the folded
    layout), but the head outputs are concatenated so Wo is a single
    (B*s_q, D) @ (D, D) MXU push.  No explicit k transpose (dot_general
    contracts the last dims directly).
    """
    q16 = q.astype(jnp.bfloat16)
    k16 = k.astype(jnp.bfloat16)
    v16 = v.astype(jnp.bfloat16)
    per_batch = []
    for b in range(B):                                 # static, tiny
        qb = q16[b * s_q:(b + 1) * s_q]
        kb = k16[b * s_k:(b + 1) * s_k]
        vb = v16[b * s_k:(b + 1) * s_k]
        heads = []
        for h in range(NUM_HEADS):                     # static, tiny
            lo, hi = h * D_K, (h + 1) * D_K
            s = jax.lax.dot_general(qb[:, lo:hi], kb[:, lo:hi],
                                    (((1,), (1,)), ((), ())),
                                    preferred_element_type=jnp.float32)
            s = s + bias                               # additive mask (one vadd)
            s = s - jnp.max(s, axis=-1, keepdims=True)
            p = jnp.exp(s)                             # EUP
            p = p * pl.reciprocal(jnp.sum(p, axis=-1, keepdims=True), approx=True)
            heads.append(jnp.dot(p.astype(jnp.bfloat16), vb[:, lo:hi],
                                 preferred_element_type=jnp.float32))
        per_batch.append(jnp.concatenate(heads, axis=-1))   # (s_q, D)
    cat = jnp.concatenate(per_batch, axis=0)                # (B*s_q, D)
    return jnp.dot(cat.astype(jnp.bfloat16), wo_bf16,
                   preferred_element_type=jnp.float32) + bo


# --------------------------------- the kernel ---------------------------------
def decoder_layer_kernel(x_ref, enc_ref, trg_bias_ref, src_bias_ref,
                         wqkv1_ref, bqkv1_ref, wo1_ref, bo1_ref,
                         wq2_ref, bq2_ref, wkv2_ref, bkv2_ref, wo2_ref, bo2_ref,
                         fw1_ref, fb1_ref, fw2_ref, fb2_ref,
                         lng_ref, lnb_ref,
                         o_ref):
    x = x_ref[...]                     # (B*S_T, D) f32 residual stream
    enc16 = enc_ref[...]               # (B*S_S, D) bf16 (cast once in wrapper)
    trg_bias = trg_bias_ref[...]
    src_bias = src_bias_ref[...]
    lng = lng_ref[...]
    lnb = lnb_ref[...]

    # --- sublayer 1: self-attention (dropout = identity in eval) ---
    h = _layernorm(x, lng[0], lnb[0])
    qkv = jnp.dot(h.astype(jnp.bfloat16), wqkv1_ref[...],
                  preferred_element_type=jnp.float32) + bqkv1_ref[...]    # (B*S_T, 3D)
    x = x + _attend(qkv[:, :D_MODEL],
                    qkv[:, D_MODEL:2 * D_MODEL],
                    qkv[:, 2 * D_MODEL:],
                    trg_bias, wo1_ref[...], bo1_ref[...], S_T, S_T)

    # --- sublayer 2: cross-attention (K, V from raw encoder output) ---
    h = _layernorm(x, lng[1], lnb[1])
    q = jnp.dot(h.astype(jnp.bfloat16), wq2_ref[...],
                preferred_element_type=jnp.float32) + bq2_ref[...]        # (B*S_T, D)
    kv = jnp.dot(enc16, wkv2_ref[...],
                 preferred_element_type=jnp.float32) + bkv2_ref[...]      # (B*S_S, 2D)
    x = x + _attend(q, kv[:, :D_MODEL], kv[:, D_MODEL:],
                    src_bias, wo2_ref[...], bo2_ref[...], S_T, S_S)

    # --- sublayer 3: feed-forward (Linear -> ReLU -> Linear) ---
    h = _layernorm(x, lng[2], lnb[2])
    ff = jnp.maximum(jnp.dot(h.astype(jnp.bfloat16), fw1_ref[...],
                             preferred_element_type=jnp.float32) + fb1_ref[...], 0.0)
    x = x + jnp.dot(ff.astype(jnp.bfloat16), fw2_ref[...],
                    preferred_element_type=jnp.float32) + fb2_ref[...]

    o_ref[...] = x.astype(o_ref.dtype)


# ------------------------- one-time packing + hot path -------------------------
def prepare_decoder_inputs(params, src_mask, trg_mask):
    """One-time prep (hoisted out of the per-call path): fuse Q/K/V projections,
    fold the 1/sqrt(d_k) attention scale into the Q weights/bias, convert masks to
    additive biases, and cast all matmul weights to bf16 (biases stay f32)."""
    aw1, ab1, aw2, ab2, fw1, fb1, fw2, fb2, lng, lnb = params
    scale = 1.0 / math.sqrt(D_K)

    wqkv1 = jnp.concatenate([aw1[0] * scale, aw1[1], aw1[2]], axis=1).astype(jnp.bfloat16)
    bqkv1 = jnp.concatenate([ab1[0] * scale, ab1[1], ab1[2]])[None, :]     # (1, 3D) f32
    wo1, bo1 = aw1[3].astype(jnp.bfloat16), ab1[3][None, :]

    wq2, bq2 = (aw2[0] * scale).astype(jnp.bfloat16), (ab2[0] * scale)[None, :]
    wkv2 = jnp.concatenate([aw2[1], aw2[2]], axis=1).astype(jnp.bfloat16)  # (D, 2D)
    bkv2 = jnp.concatenate([ab2[1], ab2[2]])[None, :]                      # (1, 2D)
    wo2, bo2 = aw2[3].astype(jnp.bfloat16), ab2[3][None, :]

    # Additive mask bias: 0 where attend, -1e9 where masked.
    trg_bias = (trg_mask - 1.0) * NEG_INF
    src_bias = (src_mask - 1.0) * NEG_INF

    return (trg_bias, src_bias,
            wqkv1, bqkv1, wo1, bo1,
            wq2, bq2, wkv2, bkv2, wo2, bo2,
            fw1.astype(jnp.bfloat16), fb1, fw2.astype(jnp.bfloat16), fb2,
            lng, lnb)


@jax.jit
def decoder_layer_pallas(x, enc, packed):
    # Single gridless invocation: every operand (a few KiB total) is delivered
    # whole into VMEM, so there is no per-step pipeline overhead.
    out = pl.pallas_call(
        decoder_layer_kernel,
        out_shape=jax.ShapeDtypeStruct((B * S_T, D_MODEL), jnp.float32),
    )(x.reshape(B * S_T, D_MODEL),
      enc.reshape(B * S_S, D_MODEL).astype(jnp.bfloat16),
      *packed)
    return out.reshape(B, S_T, D_MODEL)


# ----------------------------- pure-JAX reference -----------------------------
def _ref_mha(q_in, kv_in, mask, w, b):
    q = q_in @ w[0] + b[0]
    k = kv_in @ w[1] + b[1]
    v = kv_in @ w[2] + b[2]
    scale = 1.0 / math.sqrt(D_K)
    outs = []
    for h in range(NUM_HEADS):
        lo, hi = h * D_K, (h + 1) * D_K
        s = (q[:, lo:hi] @ k[:, lo:hi].T) * scale
        s = jnp.where(mask == 0, -1e9, s)
        p = jax.nn.softmax(s, axis=-1)
        outs.append(p @ v[:, lo:hi])
    return jnp.concatenate(outs, axis=-1) @ w[3] + b[3]


def decoder_layer_ref(x, enc, src_mask, trg_mask, params):
    aw1, ab1, aw2, ab2, fw1, fb1, fw2, fb2, lng, lnb = params

    def one(xb, encb):
        h = _layernorm(xb, lng[0], lnb[0])
        xb = xb + _ref_mha(h, h, trg_mask, aw1, ab1)
        h = _layernorm(xb, lng[1], lnb[1])
        xb = xb + _ref_mha(h, encb, src_mask, aw2, ab2)
        h = _layernorm(xb, lng[2], lnb[2])
        ff = jnp.maximum(h @ fw1 + fb1, 0.0)
        return xb + ff @ fw2 + fb2

    return jax.vmap(one)(x, enc)


# ------------------------------------ main ------------------------------------
if __name__ == "__main__":
    key = jax.random.PRNGKey(0)
    ks = jax.random.split(key, 12)

    scale = 0.1
    aw1 = scale * jax.random.normal(ks[0], (4, D_MODEL, D_MODEL), jnp.float32)
    ab1 = scale * jax.random.normal(ks[1], (4, D_MODEL), jnp.float32)
    aw2 = scale * jax.random.normal(ks[2], (4, D_MODEL, D_MODEL), jnp.float32)
    ab2 = scale * jax.random.normal(ks[3], (4, D_MODEL), jnp.float32)
    fw1 = scale * jax.random.normal(ks[4], (D_MODEL, D_FF), jnp.float32)
    fb1 = scale * jax.random.normal(ks[5], (1, D_FF), jnp.float32)
    fw2 = scale * jax.random.normal(ks[6], (D_FF, D_MODEL), jnp.float32)
    fb2 = scale * jax.random.normal(ks[7], (1, D_MODEL), jnp.float32)
    lng = jnp.ones((3, D_MODEL), jnp.float32)       # LayerNorm gamma
    lnb = jnp.zeros((3, D_MODEL), jnp.float32)      # LayerNorm beta
    params = (aw1, ab1, aw2, ab2, fw1, fb1, fw2, fb2, lng, lnb)

    x = jax.random.normal(ks[8], (B, S_T, D_MODEL), jnp.float32)
    enc = jax.random.normal(ks[9], (B, S_S, D_MODEL), jnp.float32)
    # causal target mask, all-ones source mask (1 = attend)
    trg_mask = jnp.tril(jnp.ones((S_T, S_T), jnp.float32))
    src_mask = jnp.ones((S_T, S_S), jnp.float32)

    # One-time prep (weight packing / scale folding / mask conversion) hoisted
    # out of the per-call path.
    packed = prepare_decoder_inputs(params, src_mask, trg_mask)
    packed = jax.block_until_ready(packed)

    out = decoder_layer_pallas(x, enc, packed)
    out = jax.block_until_ready(out)

    ref = decoder_layer_ref(x, enc, src_mask, trg_mask, params)
    assert out.shape == (B, S_T, D_MODEL)
    assert bool(jnp.all(jnp.isfinite(out)))
    assert bool(jnp.allclose(out, ref, rtol=2e-2, atol=2e-2)), "mismatch vs reference"
    print("KERNEL_OK")
</pallas_src>

<mosaic_0001>
module attributes {stable_mosaic.version = 11 : i64} {
  func.func @decoder_layer_kernel(%arg0: memref<16x32xf32, #tpu.memory_space<vmem>>, %arg1: memref<16x32xbf16, #tpu.memory_space<vmem>>, %arg2: memref<8x8xf32, #tpu.memory_space<vmem>>, %arg3: memref<8x8xf32, #tpu.memory_space<vmem>>, %arg4: memref<32x96xbf16, #tpu.memory_space<vmem>>, %arg5: memref<1x96xf32, #tpu.memory_space<vmem>>, %arg6: memref<32x32xbf16, #tpu.memory_space<vmem>>, %arg7: memref<1x32xf32, #tpu.memory_space<vmem>>, %arg8: memref<32x32xbf16, #tpu.memory_space<vmem>>, %arg9: memref<1x32xf32, #tpu.memory_space<vmem>>, %arg10: memref<32x64xbf16, #tpu.memory_space<vmem>>, %arg11: memref<1x64xf32, #tpu.memory_space<vmem>>, %arg12: memref<32x32xbf16, #tpu.memory_space<vmem>>, %arg13: memref<1x32xf32, #tpu.memory_space<vmem>>, %arg14: memref<32x64xbf16, #tpu.memory_space<vmem>>, %arg15: memref<1x64xf32, #tpu.memory_space<vmem>>, %arg16: memref<64x32xbf16, #tpu.memory_space<vmem>>, %arg17: memref<1x32xf32, #tpu.memory_space<vmem>>, %arg18: memref<3x32xf32, #tpu.memory_space<vmem>>, %arg19: memref<3x32xf32, #tpu.memory_space<vmem>>, %arg20: memref<16x32xf32, #tpu.memory_space<vmem>>) attributes {dimension_semantics = [], scalar_prefetch = 0 : i64, scratch_operands = 0 : i64, tpu.core_type = #tpu.core_type<tc>} {
    %c0 = arith.constant 0 : index
    %c0_0 = arith.constant 0 : index
    %0 = vector.load %arg0[%c0, %c0_0] : memref<16x32xf32, #tpu.memory_space<vmem>>, vector<16x32xf32>
    %c0_1 = arith.constant 0 : index
    %c0_2 = arith.constant 0 : index
    %1 = vector.load %arg1[%c0_1, %c0_2] : memref<16x32xbf16, #tpu.memory_space<vmem>>, vector<16x32xbf16>
    %c0_3 = arith.constant 0 : index
    %c0_4 = arith.constant 0 : index
    %2 = vector.load %arg2[%c0_3, %c0_4] : memref<8x8xf32, #tpu.memory_space<vmem>>, vector<8x8xf32>
    %c0_5 = arith.constant 0 : index
    %c0_6 = arith.constant 0 : index
    %3 = vector.load %arg3[%c0_5, %c0_6] : memref<8x8xf32, #tpu.memory_space<vmem>>, vector<8x8xf32>
    %c0_7 = arith.constant 0 : index
    %c0_8 = arith.constant 0 : index
    %4 = vector.load %arg18[%c0_7, %c0_8] : memref<3x32xf32, #tpu.memory_space<vmem>>, vector<3x32xf32>
    %c0_9 = arith.constant 0 : index
    %c0_10 = arith.constant 0 : index
    %5 = vector.load %arg19[%c0_9, %c0_10] : memref<3x32xf32, #tpu.memory_space<vmem>>, vector<3x32xf32>
    %6 = vector.extract_strided_slice %4 {offsets = [0, 0], sizes = [1, 32], strides = [1, 1]} : vector<3x32xf32> to vector<1x32xf32>
    %7 = vector.shape_cast %6 : vector<1x32xf32> to vector<32xf32>
    %8 = vector.extract_strided_slice %5 {offsets = [0, 0], sizes = [1, 32], strides = [1, 1]} : vector<3x32xf32> to vector<1x32xf32>
    %9 = vector.shape_cast %8 : vector<1x32xf32> to vector<32xf32>
    %cst = arith.constant dense<0.000000e+00> : vector<16xf32>
    %10 = vector.multi_reduction <add>, %0, %cst [1] : vector<16x32xf32> to vector<16xf32>
    %11 = vector.shape_cast %10 : vector<16xf32> to vector<16x1xf32>
    %cst_11 = arith.constant 3.200000e+01 : f32
    %12 = vector.broadcast %cst_11 : f32 to vector<16x1xf32>
    %13 = arith.divf %11, %12 : vector<16x1xf32>
    %14 = vector.broadcast %13 : vector<16x1xf32> to vector<16x32xf32>
    %15 = arith.subf %0, %14 : vector<16x32xf32>
    %16 = arith.mulf %15, %15 : vector<16x32xf32>
    %cst_12 = arith.constant dense<0.000000e+00> : vector<16xf32>
    %17 = vector.multi_reduction <add>, %16, %cst_12 [1] : vector<16x32xf32> to vector<16xf32>
    %18 = vector.shape_cast %17 : vector<16xf32> to vector<16x1xf32>
    %cst_13 = arith.constant 3.200000e+01 : f32
    %19 = vector.broadcast %cst_13 : f32 to vector<16x1xf32>
    %20 = arith.divf %18, %19 : vector<16x1xf32>
    %21 = vector.broadcast %13 : vector<16x1xf32> to vector<16x32xf32>
    %22 = arith.subf %0, %21 : vector<16x32xf32>
    %cst_14 = arith.constant 9.99999974E-6 : f32
    %23 = vector.broadcast %cst_14 : f32 to vector<16x1xf32>
    %24 = arith.addf %20, %23 : vector<16x1xf32>
    %25 = math.rsqrt %24 : vector<16x1xf32>
    %26 = vector.broadcast %25 : vector<16x1xf32> to vector<16x32xf32>
    %27 = arith.mulf %22, %26 : vector<16x32xf32>
    %28 = vector.shape_cast %7 : vector<32xf32> to vector<1x32xf32>
    %29 = vector.broadcast %28 : vector<1x32xf32> to vector<16x32xf32>
    %30 = arith.mulf %27, %29 : vector<16x32xf32>
    %31 = vector.shape_cast %9 : vector<32xf32> to vector<1x32xf32>
    %32 = vector.broadcast %31 : vector<1x32xf32> to vector<16x32xf32>
    %33 = arith.addf %30, %32 : vector<16x32xf32>
    %34 = arith.truncf %33 : vector<16x32xf32> to vector<16x32xbf16>
    %c0_15 = arith.constant 0 : index
    %c0_16 = arith.constant 0 : index
    %35 = vector.load %arg4[%c0_15, %c0_16] : memref<32x96xbf16, #tpu.memory_space<vmem>>, vector<32x96xbf16>
    %cst_17 = arith.constant dense<0.000000e+00> : vector<16x96xf32>
    %36 = tpu.matmul %34, %35, %cst_17 {dimension_numbers = #tpu.dot_dimension_numbers<[1], [0], [0], [1], [0, 0, 1, 1], [], []>} : vector<16x32xbf16>, vector<32x96xbf16>, vector<16x96xf32> -> vector<16x96xf32>
    %c0_18 = arith.constant 0 : index
    %c0_19 = arith.constant 0 : index
    %37 = vector.load %arg5[%c0_18, %c0_19] : memref<1x96xf32, #tpu.memory_space<vmem>>, vector<1x96xf32>
    %38 = vector.broadcast %37 : vector<1x96xf32> to vector<16x96xf32>
    %39 = arith.addf %36, %38 : vector<16x96xf32>
    %40 = vector.extract_strided_slice %39 {offsets = [0, 0], sizes = [16, 32], strides = [1, 1]} : vector<16x96xf32> to vector<16x32xf32>
    %41 = vector.extract_strided_slice %39 {offsets = [0, 32], sizes = [16, 32], strides = [1, 1]} : vector<16x96xf32> to vector<16x32xf32>
    %42 = vector.extract_strided_slice %39 {offsets = [0, 64], sizes = [16, 32], strides = [1, 1]} : vector<16x96xf32> to vector<16x32xf32>
    %c0_20 = arith.constant 0 : index
    %c0_21 = arith.constant 0 : index
    %43 = vector.load %arg6[%c0_20, %c0_21] : memref<32x32xbf16, #tpu.memory_space<vmem>>, vector<32x32xbf16>
    %c0_22 = arith.constant 0 : index
    %c0_23 = arith.constant 0 : index
    %44 = vector.load %arg7[%c0_22, %c0_23] : memref<1x32xf32, #tpu.memory_space<vmem>>, vector<1x32xf32>
    %45 = arith.truncf %40 : vector<16x32xf32> to vector<16x32xbf16>
    %46 = arith.truncf %41 : vector<16x32xf32> to vector<16x32xbf16>
    %47 = arith.truncf %42 : vector<16x32xf32> to vector<16x32xbf16>
    %48 = vector.extract_strided_slice %45 {offsets = [0, 0], sizes = [8, 32], strides = [1, 1]} : vector<16x32xbf16> to vector<8x32xbf16>
    %49 = vector.extract_strided_slice %46 {offsets = [0, 0], sizes = [8, 32], strides = [1, 1]} : vector<16x32xbf16> to vector<8x32xbf16>
    %50 = vector.extract_strided_slice %47 {offsets = [0, 0], sizes = [8, 32], strides = [1, 1]} : vector<16x32xbf16> to vector<8x32xbf16>
    %51 = vector.extract_strided_slice %48 {offsets = [0, 0], sizes = [8, 8], strides = [1, 1]} : vector<8x32xbf16> to vector<8x8xbf16>
    %52 = vector.extract_strided_slice %49 {offsets = [0, 0], sizes = [8, 8], strides = [1, 1]} : vector<8x32xbf16> to vector<8x8xbf16>
    %cst_24 = arith.constant dense<0.000000e+00> : vector<8x8xf32>
    %53 = tpu.matmul %51, %52, %cst_24 {dimension_numbers = #tpu.dot_dimension_numbers<[1], [1], [0], [0], [0, 0, 1, 0], [], []>} : vector<8x8xbf16>, vector<8x8xbf16>, vector<8x8xf32> -> vector<8x8xf32>
    %54 = arith.addf %53, %2 : vector<8x8xf32>
    %cst_25 = arith.constant dense<0xFF800000> : vector<8xf32>
    %55 = vector.multi_reduction <maximumf>, %54, %cst_25 [1] : vector<8x8xf32> to vector<8xf32>
    %56 = vector.shape_cast %55 : vector<8xf32> to vector<8x1xf32>
    %57 = vector.broadcast %56 : vector<8x1xf32> to vector<8x8xf32>
    %58 = arith.subf %54, %57 : vector<8x8xf32>
    %59 = math.exp %58 : vector<8x8xf32>
    %cst_26 = arith.constant dense<0.000000e+00> : vector<8xf32>
    %60 = vector.multi_reduction <add>, %59, %cst_26 [1] : vector<8x8xf32> to vector<8xf32>
    %61 = vector.shape_cast %60 : vector<8xf32> to vector<8x1xf32>
    %62 = tpu.reciprocal %61 {approx = true} : vector<8x1xf32> -> vector<8x1xf32>
    %63 = vector.broadcast %62 : vector<8x1xf32> to vector<8x8xf32>
    %64 = arith.mulf %59, %63 : vector<8x8xf32>
    %65 = arith.truncf %64 : vector<8x8xf32> to vector<8x8xbf16>
    %66 = vector.extract_strided_slice %50 {offsets = [0, 0], sizes = [8, 8], strides = [1, 1]} : vector<8x32xbf16> to vector<8x8xbf16>
    %cst_27 = arith.constant dense<0.000000e+00> : vector<8x8xf32>
    %67 = tpu.matmul %65, %66, %cst_27 {dimension_numbers = #tpu.dot_dimension_numbers<[1], [0], [0], [1], [0, 0, 1, 1], [], []>} : vector<8x8xbf16>, vector<8x8xbf16>, vector<8x8xf32> -> vector<8x8xf32>
    %68 = vector.extract_strided_slice %48 {offsets = [0, 8], sizes = [8, 8], strides = [1, 1]} : vector<8x32xbf16> to vector<8x8xbf16>
    %69 = vector.extract_strided_slice %49 {offsets = [0, 8], sizes = [8, 8], strides = [1, 1]} : vector<8x32xbf16> to vector<8x8xbf16>
    %cst_28 = arith.constant dense<0.000000e+00> : vector<8x8xf32>
    %70 = tpu.matmul %68, %69, %cst_28 {dimension_numbers = #tpu.dot_dimension_numbers<[1], [1], [0], [0], [0, 0, 1, 0], [], []>} : vector<8x8xbf16>, vector<8x8xbf16>, vector<8x8xf32> -> vector<8x8xf32>
    %71 = arith.addf %70, %2 : vector<8x8xf32>
    %cst_29 = arith.constant dense<0xFF800000> : vector<8xf32>
    %72 = vector.multi_reduction <maximumf>, %71, %cst_29 [1] : vector<8x8xf32> to vector<8xf32>
    %73 = vector.shape_cast %72 : vector<8xf32> to vector<8x1xf32>
    %74 = vector.broadcast %73 : vector<8x1xf32> to vector<8x8xf32>
    %75 = arith.subf %71, %74 : vector<8x8xf32>
    %76 = math.exp %75 : vector<8x8xf32>
    %cst_30 = arith.constant dense<0.000000e+00> : vector<8xf32>
    %77 = vector.multi_reduction <add>, %76, %cst_30 [1] : vector<8x8xf32> to vector<8xf32>
    %78 = vector.shape_cast %77 : vector<8xf32> to vector<8x1xf32>
    %79 = tpu.reciprocal %78 {approx = true} : vector<8x1xf32> -> vector<8x1xf32>
    %80 = vector.broadcast %79 : vector<8x1xf32> to vector<8x8xf32>
    %81 = arith.mulf %76, %80 : vector<8x8xf32>
    %82 = arith.truncf %81 : vector<8x8xf32> to vector<8x8xbf16>
    %83 = vector.extract_strided_slice %50 {offsets = [0, 8], sizes = [8, 8], strides = [1, 1]} : vector<8x32xbf16> to vector<8x8xbf16>
    %cst_31 = arith.constant dense<0.000000e+00> : vector<8x8xf32>
    %84 = tpu.matmul %82, %83, %cst_31 {dimension_numbers = #tpu.dot_dimension_numbers<[1], [0], [0], [1], [0, 0, 1, 1], [], []>} : vector<8x8xbf16>, vector<8x8xbf16>, vector<8x8xf32> -> vector<8x8xf32>
    %85 = vector.extract_strided_slice %48 {offsets = [0, 16], sizes = [8, 8], strides = [1, 1]} : vector<8x32xbf16> to vector<8x8xbf16>
    %86 = vector.extract_strided_slice %49 {offsets = [0, 16], sizes = [8, 8], strides = [1, 1]} : vector<8x32xbf16> to vector<8x8xbf16>
    %cst_32 = arith.constant dense<0.000000e+00> : vector<8x8xf32>
    %87 = tpu.matmul %85, %86, %cst_32 {dimension_numbers = #tpu.dot_dimension_numbers<[1], [1], [0], [0], [0, 0, 1, 0], [], []>} : vector<8x8xbf16>, vector<8x8xbf16>, vector<8x8xf32> -> vector<8x8xf32>
    %88 = arith.addf %87, %2 : vector<8x8xf32>
    %cst_33 = arith.constant dense<0xFF800000> : vector<8xf32>
    %89 = vector.multi_reduction <maximumf>, %88, %cst_33 [1] : vector<8x8xf32> to vector<8xf32>
    %90 = vector.shape_cast %89 : vector<8xf32> to vector<8x1xf32>
    %91 = vector.broadcast %90 : vector<8x1xf32> to vector<8x8xf32>
    %92 = arith.subf %88, %91 : vector<8x8xf32>
    %93 = math.exp %92 : vector<8x8xf32>
    %cst_34 = arith.constant dense<0.000000e+00> : vector<8xf32>
    %94 = vector.multi_reduction <add>, %93, %cst_34 [1] : vector<8x8xf32> to vector<8xf32>
    %95 = vector.shape_cast %94 : vector<8xf32> to vector<8x1xf32>
    %96 = tpu.reciprocal %95 {approx = true} : vector<8x1xf32> -> vector<8x1xf32>
    %97 = vector.broadcast %96 : vector<8x1xf32> to vector<8x8xf32>
    %98 = arith.mulf %93, %97 : vector<8x8xf32>
    %99 = arith.truncf %98 : vector<8x8xf32> to vector<8x8xbf16>
    %100 = vector.extract_strided_slice %50 {offsets = [0, 16], sizes = [8, 8], strides = [1, 1]} : vector<8x32xbf16> to vector<8x8xbf16>
    %cst_35 = arith.constant dense<0.000000e+00> : vector<8x8xf32>
    %101 = tpu.matmul %99, %100, %cst_35 {dimension_numbers = #tpu.dot_dimension_numbers<[1], [0], [0], [1], [0, 0, 1, 1], [], []>} : vector<8x8xbf16>, vector<8x8xbf16>, vector<8x8xf32> -> vector<8x8xf32>
    %102 = vector.extract_strided_slice %48 {offsets = [0, 24], sizes = [8, 8], strides = [1, 1]} : vector<8x32xbf16> to vector<8x8xbf16>
    %103 = vector.extract_strided_slice %49 {offsets = [0, 24], sizes = [8, 8], strides = [1, 1]} : vector<8x32xbf16> to vector<8x8xbf16>
    %cst_36 = arith.constant dense<0.000000e+00> : vector<8x8xf32>
    %104 = tpu.matmul %102, %103, %cst_36 {dimension_numbers = #tpu.dot_dimension_numbers<[1], [1], [0], [0], [0, 0, 1, 0], [], []>} : vector<8x8xbf16>, vector<8x8xbf16>, vector<8x8xf32> -> vector<8x8xf32>
    %105 = arith.addf %104, %2 : vector<8x8xf32>
    %cst_37 = arith.constant dense<0xFF800000> : vector<8xf32>
    %106 = vector.multi_reduction <maximumf>, %105, %cst_37 [1] : vector<8x8xf32> to vector<8xf32>
    %107 = vector.shape_cast %106 : vector<8xf32> to vector<8x1xf32>
    %108 = vector.broadcast %107 : vector<8x1xf32> to vector<8x8xf32>
    %109 = arith.subf %105, %108 : vector<8x8xf32>
    %110 = math.exp %109 : vector<8x8xf32>
    %cst_38 = arith.constant dense<0.000000e+00> : vector<8xf32>
    %111 = vector.multi_reduction <add>, %110, %cst_38 [1] : vector<8x8xf32> to vector<8xf32>
    %112 = vector.shape_cast %111 : vector<8xf32> to vector<8x1xf32>
    %113 = tpu.reciprocal %112 {approx = true} : vector<8x1xf32> -> vector<8x1xf32>
    %114 = vector.broadcast %113 : vector<8x1xf32> to vector<8x8xf32>
    %115 = arith.mulf %110, %114 : vector<8x8xf32>
    %116 = arith.truncf %115 : vector<8x8xf32> to vector<8x8xbf16>
    %117 = vector.extract_strided_slice %50 {offsets = [0, 24], sizes = [8, 8], strides = [1, 1]} : vector<8x32xbf16> to vector<8x8xbf16>
    %cst_39 = arith.constant dense<0.000000e+00> : vector<8x8xf32>
    %118 = tpu.matmul %116, %117, %cst_39 {dimension_numbers = #tpu.dot_dimension_numbers<[1], [0], [0], [1], [0, 0, 1, 1], [], []>} : vector<8x8xbf16>, vector<8x8xbf16>, vector<8x8xf32> -> vector<8x8xf32>
    %119 = tpu.concatenate %67, %84, %101, %118 in 1 : vector<8x8xf32>, vector<8x8xf32>, vector<8x8xf32>, vector<8x8xf32> -> vector<8x32xf32>
    %120 = vector.extract_strided_slice %45 {offsets = [8, 0], sizes = [8, 32], strides = [1, 1]} : vector<16x32xbf16> to vector<8x32xbf16>
    %121 = vector.extract_strided_slice %46 {offsets = [8, 0], sizes = [8, 32], strides = [1, 1]} : vector<16x32xbf16> to vector<8x32xbf16>
    %122 = vector.extract_strided_slice %47 {offsets = [8, 0], sizes = [8, 32], strides = [1, 1]} : vector<16x32xbf16> to vector<8x32xbf16>
    %123 = vector.extract_strided_slice %120 {offsets = [0, 0], sizes = [8, 8], strides = [1, 1]} : vector<8x32xbf16> to vector<8x8xbf16>
    %124 = vector.extract_strided_slice %121 {offsets = [0, 0], sizes = [8, 8], strides = [1, 1]} : vector<8x32xbf16> to vector<8x8xbf16>
    %cst_40 = arith.constant dense<0.000000e+00> : vector<8x8xf32>
    %125 = tpu.matmul %123, %124, %cst_40 {dimension_numbers = #tpu.dot_dimension_numbers<[1], [1], [0], [0], [0, 0, 1, 0], [], []>} : vector<8x8xbf16>, vector<8x8xbf16>, vector<8x8xf32> -> vector<8x8xf32>
    %126 = arith.addf %125, %2 : vector<8x8xf32>
    %cst_41 = arith.constant dense<0xFF800000> : vector<8xf32>
    %127 = vector.multi_reduction <maximumf>, %126, %cst_41 [1] : vector<8x8xf32> to vector<8xf32>
    %128 = vector.shape_cast %127 : vector<8xf32> to vector<8x1xf32>
    %129 = vector.broadcast %128 : vector<8x1xf32> to vector<8x8xf32>
    %130 = arith.subf %126, %129 : vector<8x8xf32>
    %131 = math.exp %130 : vector<8x8xf32>
    %cst_42 = arith.constant dense<0.000000e+00> : vector<8xf32>
    %132 = vector.multi_reduction <add>, %131, %cst_42 [1] : vector<8x8xf32> to vector<8xf32>
    %133 = vector.shape_cast %132 : vector<8xf32> to vector<8x1xf32>
    %134 = tpu.reciprocal %133 {approx = true} : vector<8x1xf32> -> vector<8x1xf32>
    %135 = vector.broadcast %134 : vector<8x1xf32> to vector<8x8xf32>
    %136 = arith.mulf %131, %135 : vector<8x8xf32>
    %137 = arith.truncf %136 : vector<8x8xf32> to vector<8x8xbf16>
    %138 = vector.extract_strided_slice %122 {offsets = [0, 0], sizes = [8, 8], strides = [1, 1]} : vector<8x32xbf16> to vector<8x8xbf16>
    %cst_43 = arith.constant dense<0.000000e+00> : vector<8x8xf32>
    %139 = tpu.matmul %137, %138, %cst_43 {dimension_numbers = #tpu.dot_dimension_numbers<[1], [0], [0], [1], [0, 0, 1, 1], [], []>} : vector<8x8xbf16>, vector<8x8xbf16>, vector<8x8xf32> -> vector<8x8xf32>
    %140 = vector.extract_strided_slice %120 {offsets = [0, 8], sizes = [8, 8], strides = [1, 1]} : vector<8x32xbf16> to vector<8x8xbf16>
    %141 = vector.extract_strided_slice %121 {offsets = [0, 8], sizes = [8, 8], strides = [1, 1]} : vector<8x32xbf16> to vector<8x8xbf16>
    %cst_44 = arith.constant dense<0.000000e+00> : vector<8x8xf32>
    %142 = tpu.matmul %140, %141, %cst_44 {dimension_numbers = #tpu.dot_dimension_numbers<[1], [1], [0], [0], [0, 0, 1, 0], [], []>} : vector<8x8xbf16>, vector<8x8xbf16>, vector<8x8xf32> -> vector<8x8xf32>
    %143 = arith.addf %142, %2 : vector<8x8xf32>
    %cst_45 = arith.constant dense<0xFF800000> : vector<8xf32>
    %144 = vector.multi_reduction <maximumf>, %143, %cst_45 [1] : vector<8x8xf32> to vector<8xf32>
    %145 = vector.shape_cast %144 : vector<8xf32> to vector<8x1xf32>
    %146 = vector.broadcast %145 : vector<8x1xf32> to vector<8x8xf32>
    %147 = arith.subf %143, %146 : vector<8x8xf32>
    %148 = math.exp %147 : vector<8x8xf32>
    %cst_46 = arith.constant dense<0.000000e+00> : vector<8xf32>
    %149 = vector.multi_reduction <add>, %148, %cst_46 [1] : vector<8x8xf32> to vector<8xf32>
    %150 = vector.shape_cast %149 : vector<8xf32> to vector<8x1xf32>
    %151 = tpu.reciprocal %150 {approx = true} : vector<8x1xf32> -> vector<8x1xf32>
    %152 = vector.broadcast %151 : vector<8x1xf32> to vector<8x8xf32>
    %153 = arith.mulf %148, %152 : vector<8x8xf32>
    %154 = arith.truncf %153 : vector<8x8xf32> to vector<8x8xbf16>
    %155 = vector.extract_strided_slice %122 {offsets = [0, 8], sizes = [8, 8], strides = [1, 1]} : vector<8x32xbf16> to vector<8x8xbf16>
    %cst_47 = arith.constant dense<0.000000e+00> : vector<8x8xf32>
    %156 = tpu.matmul %154, %155, %cst_47 {dimension_numbers = #tpu.dot_dimension_numbers<[1], [0], [0], [1], [0, 0, 1, 1], [], []>} : vector<8x8xbf16>, vector<8x8xbf16>, vector<8x8xf32> -> vector<8x8xf32>
    %157 = vector.extract_strided_slice %120 {offsets = [0, 16], sizes = [8, 8], strides = [1, 1]} : vector<8x32xbf16> to vector<8x8xbf16>
    %158 = vector.extract_strided_slice %121 {offsets = [0, 16], sizes = [8, 8], strides = [1, 1]} : vector<8x32xbf16> to vector<8x8xbf16>
    %cst_48 = arith.constant dense<0.000000e+00> : vector<8x8xf32>
    %159 = tpu.matmul %157, %158, %cst_48 {dimension_numbers = #tpu.dot_dimension_numbers<[1], [1], [0], [0], [0, 0, 1, 0], [], []>} : vector<8x8xbf16>, vector<8x8xbf16>, vector<8x8xf32> -> vector<8x8xf32>
    %160 = arith.addf %159, %2 : vector<8x8xf32>
    %cst_49 = arith.constant dense<0xFF800000> : vector<8xf32>
    %161 = vector.multi_reduction <maximumf>, %160, %cst_49 [1] : vector<8x8xf32> to vector<8xf32>
    %162 = vector.shape_cast %161 : vector<8xf32> to vector<8x1xf32>
    %163 = vector.broadcast %162 : vector<8x1xf32> to vector<8x8xf32>
    %164 = arith.subf %160, %163 : vector<8x8xf32>
    %165 = math.exp %164 : vector<8x8xf32>
    %cst_50 = arith.constant dense<0.000000e+00> : vector<8xf32>
    %166 = vector.multi_reduction <add>, %165, %cst_50 [1] : vector<8x8xf32> to vector<8xf32>
    %167 = vector.shape_cast %166 : vector<8xf32> to vector<8x1xf32>
    %168 = tpu.reciprocal %167 {approx = true} : vector<8x1xf32> -> vector<8x1xf32>
    %169 = vector.broadcast %168 : vector<8x1xf32> to vector<8x8xf32>
    %170 = arith.mulf %165, %169 : vector<8x8xf32>
    %171 = arith.truncf %170 : vector<8x8xf32> to vector<8x8xbf16>
    %172 = vector.extract_strided_slice %122 {offsets = [0, 16], sizes = [8, 8], strides = [1, 1]} : vector<8x32xbf16> to vector<8x8xbf16>
    %cst_51 = arith.constant dense<0.000000e+00> : vector<8x8xf32>
    %173 = tpu.matmul %171, %172, %cst_51 {dimension_numbers = #tpu.dot_dimension_numbers<[1], [0], [0], [1], [0, 0, 1, 1], [], []>} : vector<8x8xbf16>, vector<8x8xbf16>, vector<8x8xf32> -> vector<8x8xf32>
    %174 = vector.extract_strided_slice %120 {offsets = [0, 24], sizes = [8, 8], strides = [1, 1]} : vector<8x32xbf16> to vector<8x8xbf16>
    %175 = vector.extract_strided_slice %121 {offsets = [0, 24], sizes = [8, 8], strides = [1, 1]} : vector<8x32xbf16> to vector<8x8xbf16>
    %cst_52 = arith.constant dense<0.000000e+00> : vector<8x8xf32>
    %176 = tpu.matmul %174, %175, %cst_52 {dimension_numbers = #tpu.dot_dimension_numbers<[1], [1], [0], [0], [0, 0, 1, 0], [], []>} : vector<8x8xbf16>, vector<8x8xbf16>, vector<8x8xf32> -> vector<8x8xf32>
    %177 = arith.addf %176, %2 : vector<8x8xf32>
    %cst_53 = arith.constant dense<0xFF800000> : vector<8xf32>
    %178 = vector.multi_reduction <maximumf>, %177, %cst_53 [1] : vector<8x8xf32> to vector<8xf32>
    %179 = vector.shape_cast %178 : vector<8xf32> to vector<8x1xf32>
    %180 = vector.broadcast %179 : vector<8x1xf32> to vector<8x8xf32>
    %181 = arith.subf %177, %180 : vector<8x8xf32>
    %182 = math.exp %181 : vector<8x8xf32>
    %cst_54 = arith.constant dense<0.000000e+00> : vector<8xf32>
    %183 = vector.multi_reduction <add>, %182, %cst_54 [1] : vector<8x8xf32> to vector<8xf32>
    %184 = vector.shape_cast %183 : vector<8xf32> to vector<8x1xf32>
    %185 = tpu.reciprocal %184 {approx = true} : vector<8x1xf32> -> vector<8x1xf32>
    %186 = vector.broadcast %185 : vector<8x1xf32> to vector<8x8xf32>
    %187 = arith.mulf %182, %186 : vector<8x8xf32>
    %188 = arith.truncf %187 : vector<8x8xf32> to vector<8x8xbf16>
    %189 = vector.extract_strided_slice %122 {offsets = [0, 24], sizes = [8, 8], strides = [1, 1]} : vector<8x32xbf16> to vector<8x8xbf16>
    %cst_55 = arith.constant dense<0.000000e+00> : vector<8x8xf32>
    %190 = tpu.matmul %188, %189, %cst_55 {dimension_numbers = #tpu.dot_dimension_numbers<[1], [0], [0], [1], [0, 0, 1, 1], [], []>} : vector<8x8xbf16>, vector<8x8xbf16>, vector<8x8xf32> -> vector<8x8xf32>
    %191 = tpu.concatenate %139, %156, %173, %190 in 1 : vector<8x8xf32>, vector<8x8xf32>, vector<8x8xf32>, vector<8x8xf32> -> vector<8x32xf32>
    %192 = tpu.concatenate %119, %191 in 0 : vector<8x32xf32>, vector<8x32xf32> -> vector<16x32xf32>
    %193 = arith.truncf %192 : vector<16x32xf32> to vector<16x32xbf16>
    %cst_56 = arith.constant dense<0.000000e+00> : vector<16x32xf32>
    %194 = tpu.matmul %193, %43, %cst_56 {dimension_numbers = #tpu.dot_dimension_numbers<[1], [0], [0], [1], [0, 0, 1, 1], [], []>} : vector<16x32xbf16>, vector<32x32xbf16>, vector<16x32xf32> -> vector<16x32xf32>
    %195 = vector.broadcast %44 : vector<1x32xf32> to vector<16x32xf32>
    %196 = arith.addf %194, %195 : vector<16x32xf32>
    %197 = arith.addf %0, %196 : vector<16x32xf32>
    %198 = vector.extract_strided_slice %4 {offsets = [1, 0], sizes = [1, 32], strides = [1, 1]} : vector<3x32xf32> to vector<1x32xf32>
    %199 = vector.shape_cast %198 : vector<1x32xf32> to vector<32xf32>
    %200 = vector.extract_strided_slice %5 {offsets = [1, 0], sizes = [1, 32], strides = [1, 1]} : vector<3x32xf32> to vector<1x32xf32>
    %201 = vector.shape_cast %200 : vector<1x32xf32> to vector<32xf32>
    %cst_57 = arith.constant dense<0.000000e+00> : vector<16xf32>
    %202 = vector.multi_reduction <add>, %197, %cst_57 [1] : vector<16x32xf32> to vector<16xf32>
    %203 = vector.shape_cast %202 : vector<16xf32> to vector<16x1xf32>
    %cst_58 = arith.constant 3.200000e+01 : f32
    %204 = vector.broadcast %cst_58 : f32 to vector<16x1xf32>
    %205 = arith.divf %203, %204 : vector<16x1xf32>
    %206 = vector.broadcast %205 : vector<16x1xf32> to vector<16x32xf32>
    %207 = arith.subf %197, %206 : vector<16x32xf32>
    %208 = arith.mulf %207, %207 : vector<16x32xf32>
    %cst_59 = arith.constant dense<0.000000e+00> : vector<16xf32>
    %209 = vector.multi_reduction <add>, %208, %cst_59 [1] : vector<16x32xf32> to vector<16xf32>
    %210 = vector.shape_cast %209 : vector<16xf32> to vector<16x1xf32>
    %cst_60 = arith.constant 3.200000e+01 : f32
    %211 = vector.broadcast %cst_60 : f32 to vector<16x1xf32>
    %212 = arith.divf %210, %211 : vector<16x1xf32>
    %213 = vector.broadcast %205 : vector<16x1xf32> to vector<16x32xf32>
    %214 = arith.subf %197, %213 : vector<16x32xf32>
    %cst_61 = arith.constant 9.99999974E-6 : f32
    %215 = vector.broadcast %cst_61 : f32 to vector<16x1xf32>
    %216 = arith.addf %212, %215 : vector<16x1xf32>
    %217 = math.rsqrt %216 : vector<16x1xf32>
    %218 = vector.broadcast %217 : vector<16x1xf32> to vector<16x32xf32>
    %219 = arith.mulf %214, %218 : vector<16x32xf32>
    %220 = vector.shape_cast %199 : vector<32xf32> to vector<1x32xf32>
    %221 = vector.broadcast %220 : vector<1x32xf32> to vector<16x32xf32>
    %222 = arith.mulf %219, %221 : vector<16x32xf32>
    %223 = vector.shape_cast %201 : vector<32xf32> to vector<1x32xf32>
    %224 = vector.broadcast %223 : vector<1x32xf32> to vector<16x32xf32>
    %225 = arith.addf %222, %224 : vector<16x32xf32>
    %226 = arith.truncf %225 : vector<16x32xf32> to vector<16x32xbf16>
    %c0_62 = arith.constant 0 : index
    %c0_63 = arith.constant 0 : index
    %227 = vector.load %arg8[%c0_62, %c0_63] : memref<32x32xbf16, #tpu.memory_space<vmem>>, vector<32x32xbf16>
    %cst_64 = arith.constant dense<0.000000e+00> : vector<16x32xf32>
    %228 = tpu.matmul %226, %227, %cst_64 {dimension_numbers = #tpu.dot_dimension_numbers<[1], [0], [0], [1], [0, 0, 1, 1], [], []>} : vector<16x32xbf16>, vector<32x32xbf16>, vector<16x32xf32> -> vector<16x32xf32>
    %c0_65 = arith.constant 0 : index
    %c0_66 = arith.constant 0 : index
    %229 = vector.load %arg9[%c0_65, %c0_66] : memref<1x32xf32, #tpu.memory_space<vmem>>, vector<1x32xf32>
    %230 = vector.broadcast %229 : vector<1x32xf32> to vector<16x32xf32>
    %231 = arith.addf %228, %230 : vector<16x32xf32>
    %c0_67 = arith.constant 0 : index
    %c0_68 = arith.constant 0 : index
    %232 = vector.load %arg10[%c0_67, %c0_68] : memref<32x64xbf16, #tpu.memory_space<vmem>>, vector<32x64xbf16>
    %cst_69 = arith.constant dense<0.000000e+00> : vector<16x64xf32>
    %233 = tpu.matmul %1, %232, %cst_69 {dimension_numbers = #tpu.dot_dimension_numbers<[1], [0], [0], [1], [0, 0, 1, 1], [], []>} : vector<16x32xbf16>, vector<32x64xbf16>, vector<16x64xf32> -> vector<16x64xf32>
    %c0_70 = arith.constant 0 : index
    %c0_71 = arith.constant 0 : index
    %234 = vector.load %arg11[%c0_70, %c0_71] : memref<1x64xf32, #tpu.memory_space<vmem>>, vector<1x64xf32>
    %235 = vector.broadcast %234 : vector<1x64xf32> to vector<16x64xf32>
    %236 = arith.addf %233, %235 : vector<16x64xf32>
    %237 = vector.extract_strided_slice %236 {offsets = [0, 0], sizes = [16, 32], strides = [1, 1]} : vector<16x64xf32> to vector<16x32xf32>
    %238 = vector.extract_strided_slice %236 {offsets = [0, 32], sizes = [16, 32], strides = [1, 1]} : vector<16x64xf32> to vector<16x32xf32>
    %c0_72 = arith.constant 0 : index
    %c0_73 = arith.constant 0 : index
    %239 = vector.load %arg12[%c0_72, %c0_73] : memref<32x32xbf16, #tpu.memory_space<vmem>>, vector<32x32xbf16>
    %c0_74 = arith.constant 0 : index
    %c0_75 = arith.constant 0 : index
    %240 = vector.load %arg13[%c0_74, %c0_75] : memref<1x32xf32, #tpu.memory_space<vmem>>, vector<1x32xf32>
    %241 = arith.truncf %231 : vector<16x32xf32> to vector<16x32xbf16>
    %242 = arith.truncf %237 : vector<16x32xf32> to vector<16x32xbf16>
    %243 = arith.truncf %238 : vector<16x32xf32> to vector<16x32xbf16>
    %244 = vector.extract_strided_slice %241 {offsets = [0, 0], sizes = [8, 32], strides = [1, 1]} : vector<16x32xbf16> to vector<8x32xbf16>
    %245 = vector.extract_strided_slice %242 {offsets = [0, 0], sizes = [8, 32], strides = [1, 1]} : vector<16x32xbf16> to vector<8x32xbf16>
    %246 = vector.extract_strided_slice %243 {offsets = [0, 0], sizes = [8, 32], strides = [1, 1]} : vector<16x32xbf16> to vector<8x32xbf16>
    %247 = vector.extract_strided_slice %244 {offsets = [0, 0], sizes = [8, 8], strides = [1, 1]} : vector<8x32xbf16> to vector<8x8xbf16>
    %248 = vector.extract_strided_slice %245 {offsets = [0, 0], sizes = [8, 8], strides = [1, 1]} : vector<8x32xbf16> to vector<8x8xbf16>
    %cst_76 = arith.constant dense<0.000000e+00> : vector<8x8xf32>
    %249 = tpu.matmul %247, %248, %cst_76 {dimension_numbers = #tpu.dot_dimension_numbers<[1], [1], [0], [0], [0, 0, 1, 0], [], []>} : vector<8x8xbf16>, vector<8x8xbf16>, vector<8x8xf32> -> vector<8x8xf32>
    %250 = arith.addf %249, %3 : vector<8x8xf32>
    %cst_77 = arith.constant dense<0xFF800000> : vector<8xf32>
    %251 = vector.multi_reduction <maximumf>, %250, %cst_77 [1] : vector<8x8xf32> to vector<8xf32>
    %252 = vector.shape_cast %251 : vector<8xf32> to vector<8x1xf32>
    %253 = vector.broadcast %252 : vector<8x1xf32> to vector<8x8xf32>
    %254 = arith.subf %250, %253 : vector<8x8xf32>
    %255 = math.exp %254 : vector<8x8xf32>
    %cst_78 = arith.constant dense<0.000000e+00> : vector<8xf32>
    %256 = vector.multi_reduction <add>, %255, %cst_78 [1] : vector<8x8xf32> to vector<8xf32>
    %257 = vector.shape_cast %256 : vector<8xf32> to vector<8x1xf32>
    %258 = tpu.reciprocal %257 {approx = true} : vector<8x1xf32> -> vector<8x1xf32>
    %259 = vector.broadcast %258 : vector<8x1xf32> to vector<8x8xf32>
    %260 = arith.mulf %255, %259 : vector<8x8xf32>
    %261 = arith.truncf %260 : vector<8x8xf32> to vector<8x8xbf16>
    %262 = vector.extract_strided_slice %246 {offsets = [0, 0], sizes = [8, 8], strides = [1, 1]} : vector<8x32xbf16> to vector<8x8xbf16>
    %cst_79 = arith.constant dense<0.000000e+00> : vector<8x8xf32>
    %263 = tpu.matmul %261, %262, %cst_79 {dimension_numbers = #tpu.dot_dimension_numbers<[1], [0], [0], [1], [0, 0, 1, 1], [], []>} : vector<8x8xbf16>, vector<8x8xbf16>, vector<8x8xf32> -> vector<8x8xf32>
    %264 = vector.extract_strided_slice %244 {offsets = [0, 8], sizes = [8, 8], strides = [1, 1]} : vector<8x32xbf16> to vector<8x8xbf16>
    %265 = vector.extract_strided_slice %245 {offsets = [0, 8], sizes = [8, 8], strides = [1, 1]} : vector<8x32xbf16> to vector<8x8xbf16>
    %cst_80 = arith.constant dense<0.000000e+00> : vector<8x8xf32>
    %266 = tpu.matmul %264, %265, %cst_80 {dimension_numbers = #tpu.dot_dimension_numbers<[1], [1], [0], [0], [0, 0, 1, 0], [], []>} : vector<8x8xbf16>, vector<8x8xbf16>, vector<8x8xf32> -> vector<8x8xf32>
    %267 = arith.addf %266, %3 : vector<8x8xf32>
    %cst_81 = arith.constant dense<0xFF800000> : vector<8xf32>
    %268 = vector.multi_reduction <maximumf>, %267, %cst_81 [1] : vector<8x8xf32> to vector<8xf32>
    %269 = vector.shape_cast %268 : vector<8xf32> to vector<8x1xf32>
    %270 = vector.broadcast %269 : vector<8x1xf32> to vector<8x8xf32>
    %271 = arith.subf %267, %270 : vector<8x8xf32>
    %272 = math.exp %271 : vector<8x8xf32>
    %cst_82 = arith.constant dense<0.000000e+00> : vector<8xf32>
    %273 = vector.multi_reduction <add>, %272, %cst_82 [1] : vector<8x8xf32> to vector<8xf32>
    %274 = vector.shape_cast %273 : vector<8xf32> to vector<8x1xf32>
    %275 = tpu.reciprocal %274 {approx = true} : vector<8x1xf32> -> vector<8x1xf32>
    %276 = vector.broadcast %275 : vector<8x1xf32> to vector<8x8xf32>
    %277 = arith.mulf %272, %276 : vector<8x8xf32>
    %278 = arith.truncf %277 : vector<8x8xf32> to vector<8x8xbf16>
    %279 = vector.extract_strided_slice %246 {offsets = [0, 8], sizes = [8, 8], strides = [1, 1]} : vector<8x32xbf16> to vector<8x8xbf16>
    %cst_83 = arith.constant dense<0.000000e+00> : vector<8x8xf32>
    %280 = tpu.matmul %278, %279, %cst_83 {dimension_numbers = #tpu.dot_dimension_numbers<[1], [0], [0], [1], [0, 0, 1, 1], [], []>} : vector<8x8xbf16>, vector<8x8xbf16>, vector<8x8xf32> -> vector<8x8xf32>
    %281 = vector.extract_strided_slice %244 {offsets = [0, 16], sizes = [8, 8], strides = [1, 1]} : vector<8x32xbf16> to vector<8x8xbf16>
    %282 = vector.extract_strided_slice %245 {offsets = [0, 16], sizes = [8, 8], strides = [1, 1]} : vector<8x32xbf16> to vector<8x8xbf16>
    %cst_84 = arith.constant dense<0.000000e+00> : vector<8x8xf32>
    %283 = tpu.matmul %281, %282, %cst_84 {dimension_numbers = #tpu.dot_dimension_numbers<[1], [1], [0], [0], [0, 0, 1, 0], [], []>} : vector<8x8xbf16>, vector<8x8xbf16>, vector<8x8xf32> -> vector<8x8xf32>
    %284 = arith.addf %283, %3 : vector<8x8xf32>
    %cst_85 = arith.constant dense<0xFF800000> : vector<8xf32>
    %285 = vector.multi_reduction <maximumf>, %284, %cst_85 [1] : vector<8x8xf32> to vector<8xf32>
    %286 = vector.shape_cast %285 : vector<8xf32> to vector<8x1xf32>
    %287 = vector.broadcast %286 : vector<8x1xf32> to vector<8x8xf32>
    %288 = arith.subf %284, %287 : vector<8x8xf32>
    %289 = math.exp %288 : vector<8x8xf32>
    %cst_86 = arith.constant dense<0.000000e+00> : vector<8xf32>
    %290 = vector.multi_reduction <add>, %289, %cst_86 [1] : vector<8x8xf32> to vector<8xf32>
    %291 = vector.shape_cast %290 : vector<8xf32> to vector<8x1xf32>
    %292 = tpu.reciprocal %291 {approx = true} : vector<8x1xf32> -> vector<8x1xf32>
    %293 = vector.broadcast %292 : vector<8x1xf32> to vector<8x8xf32>
    %294 = arith.mulf %289, %293 : vector<8x8xf32>
    %295 = arith.truncf %294 : vector<8x8xf32> to vector<8x8xbf16>
    %296 = vector.extract_strided_slice %246 {offsets = [0, 16], sizes = [8, 8], strides = [1, 1]} : vector<8x32xbf16> to vector<8x8xbf16>
    %cst_87 = arith.constant dense<0.000000e+00> : vector<8x8xf32>
    %297 = tpu.matmul %295, %296, %cst_87 {dimension_numbers = #tpu.dot_dimension_numbers<[1], [0], [0], [1], [0, 0, 1, 1], [], []>} : vector<8x8xbf16>, vector<8x8xbf16>, vector<8x8xf32> -> vector<8x8xf32>
    %298 = vector.extract_strided_slice %244 {offsets = [0, 24], sizes = [8, 8], strides = [1, 1]} : vector<8x32xbf16> to vector<8x8xbf16>
    %299 = vector.extract_strided_slice %245 {offsets = [0, 24], sizes = [8, 8], strides = [1, 1]} : vector<8x32xbf16> to vector<8x8xbf16>
    %cst_88 = arith.constant dense<0.000000e+00> : vector<8x8xf32>
    %300 = tpu.matmul %298, %299, %cst_88 {dimension_numbers = #tpu.dot_dimension_numbers<[1], [1], [0], [0], [0, 0, 1, 0], [], []>} : vector<8x8xbf16>, vector<8x8xbf16>, vector<8x8xf32> -> vector<8x8xf32>
    %301 = arith.addf %300, %3 : vector<8x8xf32>
    %cst_89 = arith.constant dense<0xFF800000> : vector<8xf32>
    %302 = vector.multi_reduction <maximumf>, %301, %cst_89 [1] : vector<8x8xf32> to vector<8xf32>
    %303 = vector.shape_cast %302 : vector<8xf32> to vector<8x1xf32>
    %304 = vector.broadcast %303 : vector<8x1xf32> to vector<8x8xf32>
    %305 = arith.subf %301, %304 : vector<8x8xf32>
    %306 = math.exp %305 : vector<8x8xf32>
    %cst_90 = arith.constant dense<0.000000e+00> : vector<8xf32>
    %307 = vector.multi_reduction <add>, %306, %cst_90 [1] : vector<8x8xf32> to vector<8xf32>
    %308 = vector.shape_cast %307 : vector<8xf32> to vector<8x1xf32>
    %309 = tpu.reciprocal %308 {approx = true} : vector<8x1xf32> -> vector<8x1xf32>
    %310 = vector.broadcast %309 : vector<8x1xf32> to vector<8x8xf32>
    %311 = arith.mulf %306, %310 : vector<8x8xf32>
    %312 = arith.truncf %311 : vector<8x8xf32> to vector<8x8xbf16>
    %313 = vector.extract_strided_slice %246 {offsets = [0, 24], sizes = [8, 8], strides = [1, 1]} : vector<8x32xbf16> to vector<8x8xbf16>
    %cst_91 = arith.constant dense<0.000000e+00> : vector<8x8xf32>
    %314 = tpu.matmul %312, %313, %cst_91 {dimension_numbers = #tpu.dot_dimension_numbers<[1], [0], [0], [1], [0, 0, 1, 1], [], []>} : vector<8x8xbf16>, vector<8x8xbf16>, vector<8x8xf32> -> vector<8x8xf32>
    %315 = tpu.concatenate %263, %280, %297, %314 in 1 : vector<8x8xf32>, vector<8x8xf32>, vector<8x8xf32>, vector<8x8xf32> -> vector<8x32xf32>
    %316 = vector.extract_strided_slice %241 {offsets = [8, 0], sizes = [8, 32], strides = [1, 1]} : vector<16x32xbf16> to vector<8x32xbf16>
    %317 = vector.extract_strided_slice %242 {offsets = [8, 0], sizes = [8, 32], strides = [1, 1]} : vector<16x32xbf16> to vector<8x32xbf16>
    %318 = vector.extract_strided_slice %243 {offsets = [8, 0], sizes = [8, 32], strides = [1, 1]} : vector<16x32xbf16> to vector<8x32xbf16>
    %319 = vector.extract_strided_slice %316 {offsets = [0, 0], sizes = [8, 8], strides = [1, 1]} : vector<8x32xbf16> to vector<8x8xbf16>
    %320 = vector.extract_strided_slice %317 {offsets = [0, 0], sizes = [8, 8], strides = [1, 1]} : vector<8x32xbf16> to vector<8x8xbf16>
    %cst_92 = arith.constant dense<0.000000e+00> : vector<8x8xf32>
    %321 = tpu.matmul %319, %320, %cst_92 {dimension_numbers = #tpu.dot_dimension_numbers<[1], [1], [0], [0], [0, 0, 1, 0], [], []>} : vector<8x8xbf16>, vector<8x8xbf16>, vector<8x8xf32> -> vector<8x8xf32>
    %322 = arith.addf %321, %3 : vector<8x8xf32>
    %cst_93 = arith.constant dense<0xFF800000> : vector<8xf32>
    %323 = vector.multi_reduction <maximumf>, %322, %cst_93 [1] : vector<8x8xf32> to vector<8xf32>
    %324 = vector.shape_cast %323 : vector<8xf32> to vector<8x1xf32>
    %325 = vector.broadcast %324 : vector<8x1xf32> to vector<8x8xf32>
    %326 = arith.subf %322, %325 : vector<8x8xf32>
    %327 = math.exp %326 : vector<8x8xf32>
    %cst_94 = arith.constant dense<0.000000e+00> : vector<8xf32>
    %328 = vector.multi_reduction <add>, %327, %cst_94 [1] : vector<8x8xf32> to vector<8xf32>
    %329 = vector.shape_cast %328 : vector<8xf32> to vector<8x1xf32>
    %330 = tpu.reciprocal %329 {approx = true} : vector<8x1xf32> -> vector<8x1xf32>
    %331 = vector.broadcast %330 : vector<8x1xf32> to vector<8x8xf32>
    %332 = arith.mulf %327, %331 : vector<8x8xf32>
    %333 = arith.truncf %332 : vector<8x8xf32> to vector<8x8xbf16>
    %334 = vector.extract_strided_slice %318 {offsets = [0, 0], sizes = [8, 8], strides = [1, 1]} : vector<8x32xbf16> to vector<8x8xbf16>
    %cst_95 = arith.constant dense<0.000000e+00> : vector<8x8xf32>
    %335 = tpu.matmul %333, %334, %cst_95 {dimension_numbers = #tpu.dot_dimension_numbers<[1], [0], [0], [1], [0, 0, 1, 1], [], []>} : vector<8x8xbf16>, vector<8x8xbf16>, vector<8x8xf32> -> vector<8x8xf32>
    %336 = vector.extract_strided_slice %316 {offsets = [0, 8], sizes = [8, 8], strides = [1, 1]} : vector<8x32xbf16> to vector<8x8xbf16>
    %337 = vector.extract_strided_slice %317 {offsets = [0, 8], sizes = [8, 8], strides = [1, 1]} : vector<8x32xbf16> to vector<8x8xbf16>
    %cst_96 = arith.constant dense<0.000000e+00> : vector<8x8xf32>
    %338 = tpu.matmul %336, %337, %cst_96 {dimension_numbers = #tpu.dot_dimension_numbers<[1], [1], [0], [0], [0, 0, 1, 0], [], []>} : vector<8x8xbf16>, vector<8x8xbf16>, vector<8x8xf32> -> vector<8x8xf32>
    %339 = arith.addf %338, %3 : vector<8x8xf32>
    %cst_97 = arith.constant dense<0xFF800000> : vector<8xf32>
    %340 = vector.multi_reduction <maximumf>, %339, %cst_97 [1] : vector<8x8xf32> to vector<8xf32>
    %341 = vector.shape_cast %340 : vector<8xf32> to vector<8x1xf32>
    %342 = vector.broadcast %341 : vector<8x1xf32> to vector<8x8xf32>
    %343 = arith.subf %339, %342 : vector<8x8xf32>
    %344 = math.exp %343 : vector<8x8xf32>
    %cst_98 = arith.constant dense<0.000000e+00> : vector<8xf32>
    %345 = vector.multi_reduction <add>, %344, %cst_98 [1] : vector<8x8xf32> to vector<8xf32>
    %346 = vector.shape_cast %345 : vector<8xf32> to vector<8x1xf32>
    %347 = tpu.reciprocal %346 {approx = true} : vector<8x1xf32> -> vector<8x1xf32>
    %348 = vector.broadcast %347 : vector<8x1xf32> to vector<8x8xf32>
    %349 = arith.mulf %344, %348 : vector<8x8xf32>
    %350 = arith.truncf %349 : vector<8x8xf32> to vector<8x8xbf16>
    %351 = vector.extract_strided_slice %318 {offsets = [0, 8], sizes = [8, 8], strides = [1, 1]} : vector<8x32xbf16> to vector<8x8xbf16>
    %cst_99 = arith.constant dense<0.000000e+00> : vector<8x8xf32>
    %352 = tpu.matmul %350, %351, %cst_99 {dimension_numbers = #tpu.dot_dimension_numbers<[1], [0], [0], [1], [0, 0, 1, 1], [], []>} : vector<8x8xbf16>, vector<8x8xbf16>, vector<8x8xf32> -> vector<8x8xf32>
    %353 = vector.extract_strided_slice %316 {offsets = [0, 16], sizes = [8, 8], strides = [1, 1]} : vector<8x32xbf16> to vector<8x8xbf16>
    %354 = vector.extract_strided_slice %317 {offsets = [0, 16], sizes = [8, 8], strides = [1, 1]} : vector<8x32xbf16> to vector<8x8xbf16>
    %cst_100 = arith.constant dense<0.000000e+00> : vector<8x8xf32>
    %355 = tpu.matmul %353, %354, %cst_100 {dimension_numbers = #tpu.dot_dimension_numbers<[1], [1], [0], [0], [0, 0, 1, 0], [], []>} : vector<8x8xbf16>, vector<8x8xbf16>, vector<8x8xf32> -> vector<8x8xf32>
    %356 = arith.addf %355, %3 : vector<8x8xf32>
    %cst_101 = arith.constant dense<0xFF800000> : vector<8xf32>
    %357 = vector.multi_reduction <maximumf>, %356, %cst_101 [1] : vector<8x8xf32> to vector<8xf32>
    %358 = vector.shape_cast %357 : vector<8xf32> to vector<8x1xf32>
    %359 = vector.broadcast %358 : vector<8x1xf32> to vector<8x8xf32>
    %360 = arith.subf %356, %359 : vector<8x8xf32>
    %361 = math.exp %360 : vector<8x8xf32>
    %cst_102 = arith.constant dense<0.000000e+00> : vector<8xf32>
    %362 = vector.multi_reduction <add>, %361, %cst_102 [1] : vector<8x8xf32> to vector<8xf32>
    %363 = vector.shape_cast %362 : vector<8xf32> to vector<8x1xf32>
    %364 = tpu.reciprocal %363 {approx = true} : vector<8x1xf32> -> vector<8x1xf32>
    %365 = vector.broadcast %364 : vector<8x1xf32> to vector<8x8xf32>
    %366 = arith.mulf %361, %365 : vector<8x8xf32>
    %367 = arith.truncf %366 : vector<8x8xf32> to vector<8x8xbf16>
    %368 = vector.extract_strided_slice %318 {offsets = [0, 16], sizes = [8, 8], strides = [1, 1]} : vector<8x32xbf16> to vector<8x8xbf16>
    %cst_103 = arith.constant dense<0.000000e+00> : vector<8x8xf32>
    %369 = tpu.matmul %367, %368, %cst_103 {dimension_numbers = #tpu.dot_dimension_numbers<[1], [0], [0], [1], [0, 0, 1, 1], [], []>} : vector<8x8xbf16>, vector<8x8xbf16>, vector<8x8xf32> -> vector<8x8xf32>
    %370 = vector.extract_strided_slice %316 {offsets = [0, 24], sizes = [8, 8], strides = [1, 1]} : vector<8x32xbf16> to vector<8x8xbf16>
    %371 = vector.extract_strided_slice %317 {offsets = [0, 24], sizes = [8, 8], strides = [1, 1]} : vector<8x32xbf16> to vector<8x8xbf16>
    %cst_104 = arith.constant dense<0.000000e+00> : vector<8x8xf32>
    %372 = tpu.matmul %370, %371, %cst_104 {dimension_numbers = #tpu.dot_dimension_numbers<[1], [1], [0], [0], [0, 0, 1, 0], [], []>} : vector<8x8xbf16>, vector<8x8xbf16>, vector<8x8xf32> -> vector<8x8xf32>
    %373 = arith.addf %372, %3 : vector<8x8xf32>
    %cst_105 = arith.constant dense<0xFF800000> : vector<8xf32>
    %374 = vector.multi_reduction <maximumf>, %373, %cst_105 [1] : vector<8x8xf32> to vector<8xf32>
    %375 = vector.shape_cast %374 : vector<8xf32> to vector<8x1xf32>
    %376 = vector.broadcast %375 : vector<8x1xf32> to vector<8x8xf32>
    %377 = arith.subf %373, %376 : vector<8x8xf32>
    %378 = math.exp %377 : vector<8x8xf32>
    %cst_106 = arith.constant dense<0.000000e+00> : vector<8xf32>
    %379 = vector.multi_reduction <add>, %378, %cst_106 [1] : vector<8x8xf32> to vector<8xf32>
    %380 = vector.shape_cast %379 : vector<8xf32> to vector<8x1xf32>
    %381 = tpu.reciprocal %380 {approx = true} : vector<8x1xf32> -> vector<8x1xf32>
    %382 = vector.broadcast %381 : vector<8x1xf32> to vector<8x8xf32>
    %383 = arith.mulf %378, %382 : vector<8x8xf32>
    %384 = arith.truncf %383 : vector<8x8xf32> to vector<8x8xbf16>
    %385 = vector.extract_strided_slice %318 {offsets = [0, 24], sizes = [8, 8], strides = [1, 1]} : vector<8x32xbf16> to vector<8x8xbf16>
    %cst_107 = arith.constant dense<0.000000e+00> : vector<8x8xf32>
    %386 = tpu.matmul %384, %385, %cst_107 {dimension_numbers = #tpu.dot_dimension_numbers<[1], [0], [0], [1], [0, 0, 1, 1], [], []>} : vector<8x8xbf16>, vector<8x8xbf16>, vector<8x8xf32> -> vector<8x8xf32>
    %387 = tpu.concatenate %335, %352, %369, %386 in 1 : vector<8x8xf32>, vector<8x8xf32>, vector<8x8xf32>, vector<8x8xf32> -> vector<8x32xf32>
    %388 = tpu.concatenate %315, %387 in 0 : vector<8x32xf32>, vector<8x32xf32> -> vector<16x32xf32>
    %389 = arith.truncf %388 : vector<16x32xf32> to vector<16x32xbf16>
    %cst_108 = arith.constant dense<0.000000e+00> : vector<16x32xf32>
    %390 = tpu.matmul %389, %239, %cst_108 {dimension_numbers = #tpu.dot_dimension_numbers<[1], [0], [0], [1], [0, 0, 1, 1], [], []>} : vector<16x32xbf16>, vector<32x32xbf16>, vector<16x32xf32> -> vector<16x32xf32>
    %391 = vector.broadcast %240 : vector<1x32xf32> to vector<16x32xf32>
    %392 = arith.addf %390, %391 : vector<16x32xf32>
    %393 = arith.addf %197, %392 : vector<16x32xf32>
    %394 = vector.extract_strided_slice %4 {offsets = [2, 0], sizes = [1, 32], strides = [1, 1]} : vector<3x32xf32> to vector<1x32xf32>
    %395 = vector.shape_cast %394 : vector<1x32xf32> to vector<32xf32>
    %396 = vector.extract_strided_slice %5 {offsets = [2, 0], sizes = [1, 32], strides = [1, 1]} : vector<3x32xf32> to vector<1x32xf32>
    %397 = vector.shape_cast %396 : vector<1x32xf32> to vector<32xf32>
    %cst_109 = arith.constant dense<0.000000e+00> : vector<16xf32>
    %398 = vector.multi_reduction <add>, %393, %cst_109 [1] : vector<16x32xf32> to vector<16xf32>
    %399 = vector.shape_cast %398 : vector<16xf32> to vector<16x1xf32>
    %cst_110 = arith.constant 3.200000e+01 : f32
    %400 = vector.broadcast %cst_110 : f32 to vector<16x1xf32>
    %401 = arith.divf %399, %400 : vector<16x1xf32>
    %402 = vector.broadcast %401 : vector<16x1xf32> to vector<16x32xf32>
    %403 = arith.subf %393, %402 : vector<16x32xf32>
    %404 = arith.mulf %403, %403 : vector<16x32xf32>
    %cst_111 = arith.constant dense<0.000000e+00> : vector<16xf32>
    %405 = vector.multi_reduction <add>, %404, %cst_111 [1] : vector<16x32xf32> to vector<16xf32>
    %406 = vector.shape_cast %405 : vector<16xf32> to vector<16x1xf32>
    %cst_112 = arith.constant 3.200000e+01 : f32
    %407 = vector.broadcast %cst_112 : f32 to vector<16x1xf32>
    %408 = arith.divf %406, %407 : vector<16x1xf32>
    %409 = vector.broadcast %401 : vector<16x1xf32> to vector<16x32xf32>
    %410 = arith.subf %393, %409 : vector<16x32xf32>
    %cst_113 = arith.constant 9.99999974E-6 : f32
    %411 = vector.broadcast %cst_113 : f32 to vector<16x1xf32>
    %412 = arith.addf %408, %411 : vector<16x1xf32>
    %413 = math.rsqrt %412 : vector<16x1xf32>
    %414 = vector.broadcast %413 : vector<16x1xf32> to vector<16x32xf32>
    %415 = arith.mulf %410, %414 : vector<16x32xf32>
    %416 = vector.shape_cast %395 : vector<32xf32> to vector<1x32xf32>
    %417 = vector.broadcast %416 : vector<1x32xf32> to vector<16x32xf32>
    %418 = arith.mulf %415, %417 : vector<16x32xf32>
    %419 = vector.shape_cast %397 : vector<32xf32> to vector<1x32xf32>
    %420 = vector.broadcast %419 : vector<1x32xf32> to vector<16x32xf32>
    %421 = arith.addf %418, %420 : vector<16x32xf32>
    %422 = arith.truncf %421 : vector<16x32xf32> to vector<16x32xbf16>
    %c0_114 = arith.constant 0 : index
    %c0_115 = arith.constant 0 : index
    %423 = vector.load %arg14[%c0_114, %c0_115] : memref<32x64xbf16, #tpu.memory_space<vmem>>, vector<32x64xbf16>
    %cst_116 = arith.constant dense<0.000000e+00> : vector<16x64xf32>
    %424 = tpu.matmul %422, %423, %cst_116 {dimension_numbers = #tpu.dot_dimension_numbers<[1], [0], [0], [1], [0, 0, 1, 1], [], []>} : vector<16x32xbf16>, vector<32x64xbf16>, vector<16x64xf32> -> vector<16x64xf32>
    %c0_117 = arith.constant 0 : index
    %c0_118 = arith.constant 0 : index
    %425 = vector.load %arg15[%c0_117, %c0_118] : memref<1x64xf32, #tpu.memory_space<vmem>>, vector<1x64xf32>
    %426 = vector.broadcast %425 : vector<1x64xf32> to vector<16x64xf32>
    %427 = arith.addf %424, %426 : vector<16x64xf32>
    %cst_119 = arith.constant 0.000000e+00 : f32
    %428 = vector.broadcast %cst_119 : f32 to vector<16x64xf32>
    %429 = arith.maximumf %427, %428 : vector<16x64xf32>
    %430 = arith.truncf %429 : vector<16x64xf32> to vector<16x64xbf16>
    %c0_120 = arith.constant 0 : index
    %c0_121 = arith.constant 0 : index
    %431 = vector.load %arg16[%c0_120, %c0_121] : memref<64x32xbf16, #tpu.memory_space<vmem>>, vector<64x32xbf16>
    %cst_122 = arith.constant dense<0.000000e+00> : vector<16x32xf32>
    %432 = tpu.matmul %430, %431, %cst_122 {dimension_numbers = #tpu.dot_dimension_numbers<[1], [0], [0], [1], [0, 0, 1, 1], [], []>} : vector<16x64xbf16>, vector<64x32xbf16>, vector<16x32xf32> -> vector<16x32xf32>
    %433 = arith.addf %393, %432 : vector<16x32xf32>
    %c0_123 = arith.constant 0 : index
    %c0_124 = arith.constant 0 : index
    %434 = vector.load %arg17[%c0_123, %c0_124] : memref<1x32xf32, #tpu.memory_space<vmem>>, vector<1x32xf32>
    %435 = vector.broadcast %434 : vector<1x32xf32> to vector<16x32xf32>
    %436 = arith.addf %433, %435 : vector<16x32xf32>
    %c0_125 = arith.constant 0 : index
    %c0_126 = arith.constant 0 : index
    %437 = vector.load %arg20[%c0_125, %c0_126] : memref<16x32xf32, #tpu.memory_space<vmem>>, vector<16x32xf32>
    tpu.vector_store %arg20[%c0_125, %c0_126], %436 {strides = array<i32>} : memref<16x32xf32, #tpu.memory_space<vmem>>, vector<16x32xf32>,
    return
  }
}

</mosaic_0001>

<bundles_post_ra>
// kernel: decoder_layer_pallas.1
= control target key start
LH: loop header
LB: loop body
LE: loop exit
PB: predicated region body
PF: predicated region fallthrough
CT: control target
= control target key end

     0   :  { %s4182_s0 = inlined_call_operand.vmem [shape: f32[16,32], index: 0, kind: input, shape index: {}]   ;;  %s4183_s1 = inlined_call_operand.vmem [shape: bf16[16,32], index: 1, kind: input, shape index: {}]   ;;  %s4184_s2 = inlined_call_operand.hbm [shape: f32[8,8], index: 2, kind: input, shape index: {}]   ;;  %s4185_s3 = inlined_call_operand.hbm [shape: f32[8,8], index: 3, kind: input, shape index: {}]   ;;  %s4186_s4 = inlined_call_operand.vmem [shape: bf16[32,96], index: 4, kind: input, shape index: {}]   ;;  %s4187_s5 = inlined_call_operand.hbm [shape: f32[1,96], index: 5, kind: input, shape index: {}]   ;;  %s4188_s6 = inlined_call_operand.vmem [shape: bf16[32,32], index: 6, kind: input, shape index: {}]   ;;  %s4189_s7 = inlined_call_operand.hbm [shape: f32[1,32], index: 7, kind: input, shape index: {}]   ;;  %s4190_s8 = inlined_call_operand.vmem [shape: bf16[32,32], index: 8, kind: input, shape index: {}]   ;;  %s4191_s9 = inlined_call_operand.hbm [shape: f32[1,32], index: 9, kind: input, shape index: {}]   ;;  %s4192_s10 = inlined_call_operand.vmem [shape: bf16[32,64], index: 10, kind: input, shape index: {}]   ;;  %s4193_s11 = inlined_call_operand.hbm [shape: f32[1,64], index: 11, kind: input, shape index: {}]   ;;  %s4194_s12 = inlined_call_operand.vmem [shape: bf16[32,32], index: 12, kind: input, shape index: {}]   ;;  %s4195_s13 = inlined_call_operand.hbm [shape: f32[1,32], index: 13, kind: input, shape index: {}]   ;;  %s4196_s14 = inlined_call_operand.vmem [shape: bf16[32,64], index: 14, kind: input, shape index: {}]   ;;  %s4197_s15 = inlined_call_operand.hbm [shape: f32[1,64], index: 15, kind: input, shape index: {}]   ;;  %s4198_s16 = inlined_call_operand.vmem [shape: bf16[64,32], index: 16, kind: input, shape index: {}]   ;;  %s4199_s17 = inlined_call_operand.vmem [shape: f32[1,32], index: 17, kind: input, shape index: {}]   ;;  %s4200_s18 = inlined_call_operand.vmem [shape: f32[3,32], index: 18, kind: input, shape index: {}]   ;;  %s4201_s19 = inlined_call_operand.vmem [shape: f32[3,32], index: 19, kind: input, shape index: {}]   ;;  %s4202_s20 = inlined_call_operand.hbm [shape: f32[16,32], index: 20, kind: output, shape index: {}]  }
   0x1   :  { %4207 = sst [smem:[#allocation23_spill]] %s4182_s0 }
   0x2   :  { %4208 = sst [smem:[#allocation24_spill]] %s4183_s1 }
   0x3   :  { %4209 = sst [smem:[#allocation25_spill]] %s4184_s2 }
   0x4   :  { %4210 = sst [smem:[#allocation26_spill]] %s4185_s3 }
   0x5   :  { %4211 = sst [smem:[#allocation27_spill]] %s4186_s4 }
   0x6   :  { %25 = vsyncpa [#allocation3], 0 }
   0x7   :  { %26 = vsyncpa [#allocation6], 0 }
   0x8   :  { %27 = vsyncpa [#allocation9], 0 }
   0x9   :  { %28 = vsyncpa [#allocation12], 0 }
   0xa   :  { %29 = vsyncpa [#allocation15], 0 }
   0xb   :  { %30 = vsyncpa [#allocation4], 0  ;;  %s3398_s1 = smov [#allocation5]   ;;  %s3399_s23 = smov [#allocation8]  }
   0xc   :  { %s51_s22 = sshll.u32 %s3398_s1, 4  ;;  %s75_s24 = sshll.u32 %s3399_s23, 4  ;;  %s52_s22 = int_to_ptr.vmem [resolvable:$true] %s51_s22  ;;  %s76_s24 = int_to_ptr.vmem [resolvable:$true] %s75_s24 }
   0xd   :  { %s4212_s3 = sld [smem:[#allocation26_spill]] }
  0x13   :  { %s3188_s26 = scalar_lea.hbm %s4212_s3, 128 }
  0x14   :  { %p3189_p0 = scmp.ne.s32.totalorder %s4212_s3, %s3188_s26  ;;  %p3192_p1 = scmp.lt.u32.totalorder %s3188_s26, %s4212_s3 }
  0x16   :  { %p3194_p2 = pnand %p3192_p1, %p3189_p0 }
  0x18   :  { %3197 = shalt.err (!%p3194_p2)
}
  0x19   :  { %s3198_s30 = scalar_lea.vmem %s52_s22, 128  ;;  %p3203_p4 = scmp.lt.s32.totalorder %s52_s22, %s52_s22 }
  0x1a   :  { %p3199_p3 = scmp.ne.s32.totalorder %s52_s22, %s3198_s30  ;;  %p3204_p5 = scmp.lt.s32.totalorder %s3198_s30, %s3198_s30 }
  0x1c   :  { %p3205_p6 = por %p3204_p5, %p3203_p4 }
  0x1e   :  { %p3206_p7 = pnand %p3205_p6, %p3199_p3 }
  0x20   :  { %3209 = shalt.err (!%p3206_p7)
}
  0x21   :  { %54 = dma.hbm_to_vmem [thread:$0]  %s4212_s3, 128, %s52_s22, [#allocation6]  }
  0x22   :  { %s3210_s2 = scalar_lea.hbm %s4189_s7, 16 }
  0x23   :  { %p3211_p8 = scmp.ne.s32.totalorder %s4189_s7, %s3210_s2  ;;  %p3214_p9 = scmp.lt.u32.totalorder %s3210_s2, %s4189_s7 }
  0x25   :  { %p3216_p10 = pnand %p3214_p9, %p3211_p8 }
  0x27   :  { %3219 = shalt.err (!%p3216_p10)
}
  0x28   :  { %s3220_s4 = scalar_lea.vmem %s76_s24, 16  ;;  %s3224_s29 = scalar_lea.vmem %s76_s24, 32 }
  0x29   :  { %p3221_p11 = scmp.ne.s32.totalorder %s76_s24, %s3220_s4  ;;  %p3225_p12 = scmp.lt.s32.totalorder %s76_s24, %s76_s24 }
  0x2a   :  { %p3226_p13 = scmp.lt.s32.totalorder %s3224_s29, %s3220_s4 }
  0x2c   :  { %p3227_p0 = por %p3226_p13, %p3225_p12 }
  0x2e   :  { %p3228_p1 = pnand %p3227_p0, %p3221_p11 }
  0x30   :  { %3231 = shalt.err (!%p3228_p1)
}
  0x31   :  { %78 = dma.hbm_to_vmem [thread:$0]  %s4189_s7, 16, %s76_s24, [#allocation9]  }
  0x32   :  { %s3400_s30 = smov [#allocation11]   ;;  %s3401_s21 = smov [#allocation2]  }
  0x33   :  { %s99_s0 = sshll.u32 %s3400_s30, 4  ;;  %s41_s1 = sshll.u32 %s3401_s21, 4  ;;  %s100_s0 = int_to_ptr.vmem [resolvable:$true] %s99_s0  ;;  %s42_s1 = int_to_ptr.vmem [resolvable:$true] %s41_s1 }
  0x34   :  { %s3232_s25 = scalar_lea.hbm %s4193_s11, 16 }
  0x35   :  { %p3233_p2 = scmp.ne.s32.totalorder %s4193_s11, %s3232_s25  ;;  %p3236_p3 = scmp.lt.u32.totalorder %s3232_s25, %s4193_s11 }
  0x37   :  { %p3238_p4 = pnand %p3236_p3, %p3233_p2 }
  0x39   :  { %3241 = shalt.err (!%p3238_p4)
}
  0x3a   :  { %s3242_s7 = scalar_lea.vmem %s100_s0, 16  ;;  %s3246_s24 = scalar_lea.vmem %s100_s0, 32 }
  0x3b   :  { %p3243_p5 = scmp.ne.s32.totalorder %s100_s0, %s3242_s7  ;;  %p3247_p6 = scmp.lt.s32.totalorder %s100_s0, %s100_s0 }
  0x3c   :  { %p3248_p7 = scmp.lt.s32.totalorder %s3246_s24, %s3242_s7 }
  0x3e   :  { %p3249_p8 = por %p3248_p7, %p3247_p6 }
  0x40   :  { %p3250_p9 = pnand %p3249_p8, %p3243_p5 }
  0x42   :  { %3253 = shalt.err (!%p3250_p9)
}
  0x43   :  { %102 = dma.hbm_to_vmem [thread:$0]  %s4193_s11, 16, %s100_s0, [#allocation12]  }
  0x44   :  { %s4213_s21 = sld [smem:[#allocation25_spill]] }
  0x4a   :  { %s3254_s23 = scalar_lea.hbm %s4213_s21, 128 }
  0x4b   :  { %p3255_p10 = scmp.ne.s32.totalorder %s4213_s21, %s3254_s23  ;;  %p3258_p11 = scmp.lt.u32.totalorder %s3254_s23, %s4213_s21 }
  0x4d   :  { %p3260_p12 = pnand %p3258_p11, %p3255_p10 }
  0x4f   :  { %3263 = shalt.err (!%p3260_p12)
}
  0x50   :  { %s3264_s28 = scalar_lea.vmem %s42_s1, 128  ;;  %p3269_p0 = scmp.lt.s32.totalorder %s42_s1, %s42_s1 }
  0x51   :  { %p3265_p13 = scmp.ne.s32.totalorder %s42_s1, %s3264_s28  ;;  %p3270_p1 = scmp.lt.s32.totalorder %s3264_s28, %s3264_s28 }
  0x53   :  { %p3271_p2 = por %p3270_p1, %p3269_p0 }
  0x55   :  { %p3272_p3 = pnand %p3271_p2, %p3265_p13 }
  0x57   :  { %3275 = shalt.err (!%p3272_p3)
}
  0x58   :  { %44 = dma.hbm_to_vmem [thread:$0]  %s4213_s21, 128, %s42_s1, [#allocation3]  }
  0x59   :  { %s3402_s4 = smov [#allocation7]   ;;  %s3403_s24 = smov [#allocation10]  }
  0x5a   :  { %s63_s7 = sshll.u32 %s3402_s4, 4  ;;  %s87_s29 = sshll.u32 %s3403_s24, 4  ;;  %s64_s7 = int_to_ptr.vmem [resolvable:$true] %s63_s7  ;;  %s88_s29 = int_to_ptr.vmem [resolvable:$true] %s87_s29 }
  0x5b   :  { %s3276_s30 = scalar_lea.hbm %s4187_s5, 16 }
  0x5c   :  { %p3277_p4 = scmp.ne.s32.totalorder %s4187_s5, %s3276_s30  ;;  %p3280_p5 = scmp.lt.u32.totalorder %s3276_s30, %s4187_s5 }
  0x5e   :  { %p3282_p6 = pnand %p3280_p5, %p3277_p4 }
  0x60   :  { %3285 = shalt.err (!%p3282_p6)
}
  0x61   :  { %s3286_s1 = scalar_lea.vmem %s64_s7, 16  ;;  %s3290_s21 = scalar_lea.vmem %s64_s7, 32 }
  0x62   :  { %p3287_p7 = scmp.ne.s32.totalorder %s64_s7, %s3286_s1  ;;  %p3291_p8 = scmp.lt.s32.totalorder %s64_s7, %s64_s7 }
  0x63   :  { %p3292_p9 = scmp.lt.s32.totalorder %s3290_s21, %s3286_s1 }
  0x65   :  { %p3293_p10 = por %p3292_p9, %p3291_p8 }
  0x67   :  { %p3294_p11 = pnand %p3293_p10, %p3287_p7 }
  0x69   :  { %3297 = shalt.err (!%p3294_p11)
}
  0x6a   :  { %66 = dma.hbm_to_vmem [thread:$0]  %s4187_s5, 16, %s64_s7, [#allocation6]  }
  0x6b   :  { %s3298_s4 = scalar_lea.hbm %s4191_s9, 16 }
  0x6c   :  { %p3299_p12 = scmp.ne.s32.totalorder %s4191_s9, %s3298_s4  ;;  %p3302_p13 = scmp.lt.u32.totalorder %s3298_s4, %s4191_s9 }
  0x6e   :  { %p3304_p0 = pnand %p3302_p13, %p3299_p12 }
  0x70   :  { %3307 = shalt.err (!%p3304_p0)
}
  0x71   :  { %s3308_s23 = scalar_lea.vmem %s88_s29, 16  ;;  %s3312_s2 = scalar_lea.vmem %s88_s29, 32 }
  0x72   :  { %p3309_p1 = scmp.ne.s32.totalorder %s88_s29, %s3308_s23  ;;  %p3313_p2 = scmp.lt.s32.totalorder %s88_s29, %s88_s29 }
  0x73   :  { %p3314_p3 = scmp.lt.s32.totalorder %s3312_s2, %s3308_s23 }
  0x75   :  { %p3315_p4 = por %p3314_p3, %p3313_p2 }
  0x77   :  { %p3316_p5 = pnand %p3315_p4, %p3309_p1 }
  0x79   :  { %3319 = shalt.err (!%p3316_p5)
}
  0x7a   :  { %90 = dma.hbm_to_vmem [thread:$0]  %s4191_s9, 16, %s88_s29, [#allocation9]  }
  0x7b   :  { %s3404_s25 = smov [#allocation13]   ;;  %s3405_s1 = smov [#allocation14]  }
  0x7c   :  { %s111_s27 = sshll.u32 %s3404_s25, 4  ;;  %s123_s21 = sshll.u32 %s3405_s1, 4  ;;  %s112_s27 = int_to_ptr.vmem [resolvable:$true] %s111_s27  ;;  %s124_s21 = int_to_ptr.vmem [resolvable:$true] %s123_s21 }
  0x7d   :  { %s3320_s11 = scalar_lea.hbm %s4195_s13, 16 }
  0x7e   :  { %p3321_p6 = scmp.ne.s32.totalorder %s4195_s13, %s3320_s11  ;;  %p3324_p7 = scmp.lt.u32.totalorder %s3320_s11, %s4195_s13 }
  0x80   :  { %p3326_p8 = pnand %p3324_p7, %p3321_p6 }
  0x82   :  { %3329 = shalt.err (!%p3326_p8)
}
  0x83   :  { %s3330_s9 = scalar_lea.vmem %s112_s27, 16  ;;  %s3334_s29 = scalar_lea.vmem %s112_s27, 32 }
  0x84   :  { %p3331_p9 = scmp.ne.s32.totalorder %s112_s27, %s3330_s9  ;;  %p3335_p10 = scmp.lt.s32.totalorder %s112_s27, %s112_s27 }
  0x85   :  { %p3336_p11 = scmp.lt.s32.totalorder %s3334_s29, %s3330_s9 }
  0x87   :  { %p3337_p12 = por %p3336_p11, %p3335_p10 }
  0x89   :  { %p3338_p13 = pnand %p3337_p12, %p3331_p9 }
  0x8b   :  { %3341 = shalt.err (!%p3338_p13)
}
  0x8c   :  { %114 = dma.hbm_to_vmem [thread:$0]  %s4195_s13, 16, %s112_s27, [#allocation12]  }
  0x8d   :  { %s3342_s5 = scalar_lea.hbm %s4197_s15, 16 }
  0x8e   :  { %p3343_p0 = scmp.ne.s32.totalorder %s4197_s15, %s3342_s5  ;;  %p3346_p1 = scmp.lt.u32.totalorder %s3342_s5, %s4197_s15 }
  0x90   :  { %p3348_p2 = pnand %p3346_p1, %p3343_p0 }
  0x92   :  { %3351 = shalt.err (!%p3348_p2)
}
  0x93   :  { %s3352_s28 = scalar_lea.vmem %s124_s21, 16  ;;  %s3356_s11 = scalar_lea.vmem %s124_s21, 32 }
  0x94   :  { %p3353_p3 = scmp.ne.s32.totalorder %s124_s21, %s3352_s28  ;;  %p3357_p4 = scmp.lt.s32.totalorder %s124_s21, %s124_s21 }
  0x95   :  { %p3358_p5 = scmp.lt.s32.totalorder %s3356_s11, %s3352_s28 }
  0x97   :  { %p3359_p6 = por %p3358_p5, %p3357_p4 }
  0x99   :  { %p3360_p7 = pnand %p3359_p6, %p3353_p3 }
  0x9b   :  { %3363 = shalt.err (!%p3360_p7)
}
  0x9c   :  { %126 = dma.hbm_to_vmem [thread:$0]  %s4197_s15, 16, %s124_s21, [#allocation15]  }
  0x9d   :  { %3386 = dma.done.wait [#allocation3], 128  }
  0x9e   :  { %3387 = vsyncadd [#allocation3], 4294967168 }
  0x9f   :  { %3388 = dma.done.wait [#allocation6], 144  }
  0xa0   :  { %3389 = vsyncadd [#allocation6], 4294967152 }
  0xa1   :  { %3390 = dma.done.wait [#allocation9], 32  }
  0xa2   :  { %3391 = vsyncadd [#allocation9], 4294967264 }
  0xa3   :  { %3392 = dma.done.wait [#allocation12], 32  }
  0xa4   :  { %3393 = vsyncadd [#allocation12], 4294967264 }
  0xa5   :  { %3394 = dma.done.wait [#allocation15], 16  }
  0xa6   :  { %3395 = vsyncadd [#allocation15], 4294967280  ;;  %vm168_vm0 = vcmask 261120   ;;  %s4214_s24 = sld [smem:[#allocation23_spill]]  ;;  %s4215_s29 = sld [smem:[#allocation27_spill]]  ;;  %v3406_v15 = vmov 0.0   ;;  %v196_v21 = vlaneseq }
  0xa7   :  { %2785 = vmatprep.subr.bf16.mxu1 %v3406_v15  ;;  %2799 = vmatprep.subr.bf16.mxu0 %v3406_v15  ;;  %vm3407_vm1 = vmmov 0   ;;  %v3663_v26 = vld [vmem:[%s4200_s18] sm:$0x7]  ;;  %v2635_v39 = vld [vmem:[#allocation7] ss:$0 sm:$0xff]  ;;  %s3408_s25 = smov 88  }
  0xa8   :  { %2789 = vmatprep.mubr.msk.bf16.mxu1 %vm3407_vm1, %v3406_v15  ;;  %2801 = vmatprep.mubr.msk.bf16.mxu0 %vm3407_vm1, %v3406_v15  ;;  %v3657_v24 = vshrl.u32 %v196_v21, 7  ;;  %v3669_v30 = vld [vmem:[%s4201_s19] sm:$0x7]  ;;  %s3409_s1 = smov 96   ;;  %s3410_s26 = smov 120   ;;  %vm285_vm2 = vcmask 64512  }
  0xa9   :  { %s3411_s28 = smov 112   ;;  %s3412_s11 = smov 80   ;;  %vm349_vm3 = vcmask 1043456   ;;  %vm736_vm4 = vcmask 130048   ;;  %vm738_vm5 = vcmask 195584   ;;  %vm2556_vm6 = vcmask 523264  }
  0xaa   :  { %v198_v25 = vsub.s32 0, %v3657_v24  ;;  %s3413_s13 = smov 104   ;;  %s3414_s27 = smov 72  }
  0xab   :  { %s3415_s0 = smov 56   ;;  %s3416_s4 = smov 64  }
  0xac   :  { %v3628_v0 = vld [vmem:[%s4214_s24] sm:$0xff]  ;;  %v3633_v1 = vld [vmem:[%s4214_s24 + $0x8] sm:$0xff]  ;;  %v199_v29 = vrot.slane %v3663_v26, %v198_v25  ;;  %v205_v34 = vrot.slane %v3669_v30, %v198_v25  ;;  %s3417_s24 = smov 48   ;;  %s3418_s22 = smov 40  }
  0xad   :  { %v169_v2 = vsel %vm168_vm0, %v3628_v0, 0.0  ;;  %v172_v3 = vsel %vm168_vm0, %v3633_v1, 0.0  ;;  %v3093_v14 = vld [vmem:[%s4215_s29] sm:$0xff]   ;;  %v3094_v16 = vld [vmem:[%s4215_s29 + $0x8] sm:$0xff]   ;;  %s3419_s9 = smov 8   ;;  %s3420_s29 = smov 16  }
  0xae   :  { %170 = vadd.xlane.f32.xlu0 %v169_v2  ;;  %2786 = vmatpush3.bf16.msra.mxu1 %v3093_v14  ;;  %s3421_s23 = smov 24  }
  0xaf   :  { %2787 = vmatprep.subr.bf16.mxu1 %v3406_v15 }
  0xb2   :  { %173 = vadd.xlane.f32.xlu0 %v172_v3  ;;  %2788 = vmatpush3.bf16.msra.mxu1 %v3094_v16 }
  0xb3   :  { %2793 = vmatprep.subr.bf16.mxu1 %v3406_v15 }
 0x13b   :  { %v171_v4 = vpop.xlane.xlu0 %170 }
 0x13c   :  { %v176_v5 = vmul.f32 0.03125, %v171_v4 }
 0x13e   :  { %v178_v6 = vsub.f32 %v3628_v0, %v176_v5 }
 0x13f   :  { %v174_v7 = vpop.xlane.xlu0 %173 }
 0x140   :  { %v177_v8 = vmul.f32 0.03125, %v174_v7  ;;  %v180_v9 = vmul.f32 %v178_v6, %v178_v6 }
 0x142   :  { %v179_v10 = vsub.f32 %v3633_v1, %v177_v8  ;;  %v182_v11 = vsel %vm168_vm0, %v180_v9, 0.0  ;;  %v164_v8 = vld [vmem:[#allocation2] sm:$0xff] }
 0x143   :  { %183 = vadd.xlane.f32.xlu1 %v182_v11 }
 0x144   :  { %v181_v12 = vmul.f32 %v179_v10, %v179_v10 }
 0x146   :  { %v185_v13 = vsel %vm168_vm0, %v181_v12, 0.0 }
 0x147   :  { %186 = vadd.xlane.f32.xlu1 %v185_v13 }
 0x1d0   :  { %v184_v17 = vpop.xlane.xlu1 %183 }
 0x1d1   :  { %v188_v18 = vmul.f32 0.03125, %v184_v17 }
 0x1d3   :  { %v190_v19 = vadd.f32 1e-05, %v188_v18 }
 0x1d4   :  { %v187_v20 = vpop.xlane.xlu1 %186 }
 0x1d5   :  { %3110 = vrsqrt.f32 %v190_v19  ;;  %v189_v22 = vmul.f32 0.03125, %v187_v20 }
 0x1d7   :  { %v191_v23 = vadd.f32 1e-05, %v189_v22 }
 0x1d9   :  { %3112 = vrsqrt.f32 %v191_v23 }
 0x1df   :  { %v3111_v27 = vpop.eup %3110 }
 0x1e0   :  { %v194_v28 = vmul.f32 %v3111_v27, %v178_v6 }
 0x1e2   :  { %v200_v33 = vmul.f32 %v199_v29, %v194_v28 }
 0x1e3   :  { %v3113_v31 = vpop.eup %3112 }
 0x1e4   :  { %v195_v32 = vmul.f32 %v3113_v31, %v179_v10  ;;  %v206_v36 = vadd.f32 %v205_v34, %v200_v33 }
 0x1e6   :  { %v201_v35 = vmul.f32 %v199_v29, %v195_v32 }
 0x1e8   :  { %v207_v37 = vadd.f32 %v205_v34, %v201_v35 }
 0x1ea   :  { %v208_v38 = vpack.c.bf16 %v207_v37, %v206_v36 }
 0x1ec   :  { %2790 = vmatmul.mubr.msk.bf16.vlgmr.msra.gmra.mrb[0].mxu1 %vm168_vm0, %v208_v38 }
 0x1ed   :  { %2795 = vmatprep.mubr.msk.bf16.mxu1 %vm3407_vm1, %v3406_v15 }
 0x2bf   :  { %v269_v40 = vpop.f32.mrb[0].mxu1 }
 0x2c0   :  { %v2791_v41 = vpop.f32.mrb[1].mxu1  ;;  %v270_v43 = vadd.f32 %v2635_v39, %v269_v40 }
 0x2c1   :  { %v272_v42 = vpop.f32.mrb[2].mxu1 }
 0x2c2   :  { %v273_v44 = vadd.f32 %v2635_v39, %v272_v42  ;;  %v2792_v45 = vpop.f32.mrb[3].mxu1 }
 0x2c4   :  { %v3675_v46 = vpack.c.bf16 %v273_v44, %v270_v43 }
 0x2c6   :  { %395 = vrot.lane.b32.xlu1 %v3675_v46, %s3408_s25  ;;  %283 = vrot.lane.b32.xlu0 %v3675_v46, %s3409_s1  ;;  %v3690_v47 = vrot.slane %v3675_v46, 4 }
 0x2ca   :  { %393 = vrot.lane.b32.xlu1 %v3675_v46, %s3410_s26  ;;  %503 = vrot.lane.b32.xlu0 %v3675_v46, %s3411_s28 }
 0x2ce   :  { %505 = vrot.lane.b32.xlu1 %v3675_v46, %s3412_s11  ;;  %613 = vrot.lane.b32.xlu0 %v3675_v46, %s3413_s13 }
 0x2d2   :  { %615 = vrot.lane.b32.xlu1 %v3675_v46, %s3414_s27  ;;  %851 = vrot.lane.b32.xlu0 %v3690_v47, %s3408_s25 }
 0x2d6   :  { %961 = vrot.lane.b32.xlu0 %v3690_v47, %s3412_s11  ;;  %741 = vrot.lane.b32.xlu1 %v3690_v47, %s3409_s1 }
 0x2da   :  { %1071 = vrot.lane.b32.xlu0 %v3690_v47, %s3414_s27  ;;  %849 = vrot.lane.b32.xlu1 %v3690_v47, %s3410_s26 }
 0x2de   :  { %959 = vrot.lane.b32.xlu1 %v3690_v47, %s3411_s28 }
 0x2e2   :  { %1069 = vrot.lane.b32.xlu1 %v3690_v47, %s3413_s13 }
 0x2e6   :  { %455 = vrot.lane.b32.xlu1 %v3675_v46, %s3415_s0 }
 0x338   :  { %v284_v48 = vpop.permute.xlu0 %283  ;;  %v396_v50 = vpop.permute.xlu1 %395 }
 0x339   :  { %v290_v49 = vsel %vm285_vm2, %v284_v48, 0  ;;  %v401_v52 = vsel %vm285_vm2, %v396_v50, 0 }
 0x33a   :  { %2794 = vmatpush3.bf16.xpose.msra.mxu1 %v290_v49 }
 0x33b   :  { %2805 = vmatprep.subr.bf16.mxu1 %v3406_v15 }
 0x33c   :  { %v394_v51 = vpop.permute.xlu1 %393  ;;  %v504_v56 = vpop.permute.xlu0 %503 }
 0x340   :  { %v506_v53 = vpop.permute.xlu1 %505  ;;  %v614_v59 = vpop.permute.xlu0 %613 }
 0x341   :  { %2796 = vmatmul.mubr.msk.bf16.vlgmr.msra.gmra.mrb[4].mxu1 %vm285_vm2, %v3675_v46  ;;  %v511_v54 = vsel %vm285_vm2, %v506_v53, 0 }
 0x342   :  { %2806 = vmatpush3.bf16.xpose.msra.mxu1 %v401_v52  ;;  %2807 = vmatprep.mubr.msk.bf16.mxu1 %vm3407_vm1, %v3406_v15 }
 0x343   :  { %2817 = vmatprep.subr.bf16.mxu1 %v3406_v15 }
 0x344   :  { %v616_v55 = vpop.permute.xlu1 %615  ;;  %v852_v61 = vpop.permute.xlu0 %851 }
 0x345   :  { %v621_v57 = vsel %vm285_vm2, %v616_v55, 0  ;;  %v857_v62 = vsel %vm285_vm2, %v852_v61, 0 }
 0x348   :  { %v742_v58 = vpop.permute.xlu1 %741  ;;  %v962_v63 = vpop.permute.xlu0 %961 }
 0x349   :  { %2808 = vmatmul.mubr.msk.bf16.vlgmr.msra.gmra.mrb[8].mxu1 %vm285_vm2, %v394_v51  ;;  %v747_v60 = vsel %vm285_vm2, %v742_v58, 0  ;;  %v967_v3 = vsel %vm285_vm2, %v962_v63, 0 }
 0x34a   :  { %2818 = vmatpush3.bf16.xpose.msra.mxu1 %v511_v54  ;;  %2819 = vmatprep.mubr.msk.bf16.mxu1 %vm3407_vm1, %v3406_v15 }
 0x34b   :  { %2829 = vmatprep.subr.bf16.mxu1 %v3406_v15 }
 0x34c   :  { %v850_v2 = vpop.permute.xlu1 %849  ;;  %v1072_v4 = vpop.permute.xlu0 %1071 }
 0x34d   :  { %v1077_v6 = vsel %vm285_vm2, %v1072_v4, 0 }
 0x350   :  { %v960_v5 = vpop.permute.xlu1 %959 }
 0x351   :  { %2820 = vmatmul.mubr.msk.bf16.vlgmr.msra.gmra.mrb[12].mxu1 %vm285_vm2, %v504_v56 }
 0x352   :  { %2830 = vmatpush3.bf16.xpose.msra.mxu1 %v621_v57  ;;  %2831 = vmatprep.mubr.msk.bf16.mxu1 %vm3407_vm1, %v3406_v15 }
 0x353   :  { %2841 = vmatprep.subr.bf16.mxu1 %v3406_v15 }
 0x354   :  { %v1070_v7 = vpop.permute.xlu1 %1069 }
 0x358   :  { %v3776_v4 = vpop.permute.xlu1 %455 }
 0x359   :  { %2832 = vmatmul.mubr.msk.bf16.vlgmr.msra.gmra.mrb[16].mxu1 %vm285_vm2, %v614_v59 }
 0x35a   :  { %2842 = vmatpush3.bf16.xpose.msra.mxu1 %v747_v60  ;;  %2843 = vmatprep.mubr.msk.bf16.mxu1 %vm3407_vm1, %v3406_v15 }
 0x35b   :  { %2853 = vmatprep.subr.bf16.mxu1 %v3406_v15 }
 0x361   :  { %2844 = vmatmul.mubr.msk.bf16.vlgmr.msra.gmra.mrb[20].mxu1 %vm285_vm2, %v3690_v47 }
 0x362   :  { %2854 = vmatpush3.bf16.xpose.msra.mxu1 %v857_v62  ;;  %2855 = vmatprep.mubr.msk.bf16.mxu1 %vm3407_vm1, %v3406_v15 }
 0x363   :  { %2865 = vmatprep.subr.bf16.mxu1 %v3406_v15 }
 0x369   :  { %2856 = vmatmul.mubr.msk.bf16.vlgmr.msra.gmra.mrb[24].mxu1 %vm285_vm2, %v850_v2 }
 0x36a   :  { %2866 = vmatpush3.bf16.xpose.msra.mxu1 %v967_v3  ;;  %2867 = vmatprep.mubr.msk.bf16.mxu1 %vm3407_vm1, %v3406_v15 }
 0x36b   :  { %2877 = vmatprep.subr.bf16.mxu1 %v3406_v15 }
 0x371   :  { %2868 = vmatmul.mubr.msk.bf16.vlgmr.msra.gmra.mrb[28].mxu1 %vm285_vm2, %v960_v5 }
 0x372   :  { %2878 = vmatpush3.bf16.xpose.msra.mxu1 %v1077_v6  ;;  %2879 = vmatprep.mubr.msk.bf16.mxu1 %vm3407_vm1, %v3406_v15 }
 0x373   :  { %2889 = vmatprep.subr.bf16.mxu1 %v3406_v15 }
 0x379   :  { %2880 = vmatmul.mubr.msk.bf16.vlgmr.msra.gmra.mrb[32].mxu1 %vm285_vm2, %v1070_v7 }
 0x37a   :  { %2893 = vmatprep.mubr.msk.bf16.mxu1 %vm3407_vm1, %v3406_v15 }
 0x414   :  { %v326_v9 = vpop.f32.mrb[4].mxu1 }
 0x415   :  { %v327_v10 = vadd.f32 %v326_v9, %v164_v8  ;;  %v2797_v11 = vpop.f32.mrb[5].mxu1 }
 0x416   :  { %v329_v12 = vpop.f32.mrb[6].mxu1 }
 0x417   :  { %v2798_v13 = vpop.f32.mrb[7].mxu1  ;;  %v332_v14 = vsel %vm285_vm2, %v327_v10, -inf }
 0x418   :  { %333 = vmax.xlane.f32.xlu0 %v332_v14 }
 0x41c   :  { %v437_v16 = vpop.f32.mrb[8].mxu1 }
 0x41d   :  { %v3753_v17 = vadd.f32 %v437_v16, %v164_v8  ;;  %v2809_v18 = vpop.f32.mrb[9].mxu1 }
 0x41e   :  { %v440_v19 = vpop.f32.mrb[10].mxu1 }
 0x41f   :  { %v2810_v20 = vpop.f32.mrb[11].mxu1  ;;  %v443_v21 = vsel %vm285_vm2, %v3753_v17, -inf }
 0x420   :  { %444 = vmax.xlane.f32.xlu1 %v443_v21 }
 0x424   :  { %v547_v22 = vpop.f32.mrb[12].mxu1 }
 0x425   :  { %v2821_v23 = vpop.f32.mrb[13].mxu1  ;;  %v548_v50 = vadd.f32 %v547_v22, %v164_v8 }
 0x426   :  { %v550_v25 = vpop.f32.mrb[14].mxu1 }
 0x427   :  { %v2822_v27 = vpop.f32.mrb[15].mxu1  ;;  %v553_v53 = vsel %vm285_vm2, %v548_v50, -inf }
 0x42c   :  { %v657_v28 = vpop.f32.mrb[16].mxu1 }
 0x42d   :  { %v2833_v29 = vpop.f32.mrb[17].mxu1  ;;  %v658_v51 = vadd.f32 %v657_v28, %v164_v8 }
 0x42e   :  { %344 = vrot.lane.b32.xlu0 %v3675_v46, %s3416_s4  ;;  %v660_v31 = vpop.f32.mrb[18].mxu1 }
 0x42f   :  { %v2834_v32 = vpop.f32.mrb[19].mxu1  ;;  %v663_v60 = vsel %vm285_vm2, %v658_v51, -inf }
 0x434   :  { %v783_v33 = vpop.f32.mrb[20].mxu1 }
 0x435   :  { %v2845_v34 = vpop.f32.mrb[21].mxu1  ;;  %v784_v59 = vadd.f32 %v783_v33, %v164_v8 }
 0x436   :  { %v786_v35 = vpop.f32.mrb[22].mxu1 }
 0x437   :  { %v2846_v36 = vpop.f32.mrb[23].mxu1  ;;  %v789_v61 = vsel %vm285_vm2, %v784_v59, -inf }
 0x43c   :  { %v893_v37 = vpop.f32.mrb[24].mxu1 }
 0x43d   :  { %v3759_v38 = vadd.f32 %v893_v37, %v164_v8  ;;  %v2857_v39 = vpop.f32.mrb[25].mxu1 }
 0x43e   :  { %v896_v40 = vpop.f32.mrb[26].mxu1 }
 0x43f   :  { %v2858_v41 = vpop.f32.mrb[27].mxu1  ;;  %v899_v42 = vsel %vm285_vm2, %v3759_v38, -inf }
 0x440   :  { %900 = vmax.xlane.f32.xlu1 %v899_v42 }
 0x444   :  { %v1003_v43 = vpop.f32.mrb[28].mxu1 }
 0x445   :  { %v3763_v44 = vadd.f32 %v1003_v43, %v164_v8  ;;  %v2869_v45 = vpop.f32.mrb[29].mxu1 }
 0x446   :  { %v1006_v48 = vpop.f32.mrb[30].mxu1 }
 0x447   :  { %v2870_v49 = vpop.f32.mrb[31].mxu1  ;;  %v1009_v62 = vsel %vm285_vm2, %v3763_v44, -inf }
 0x44c   :  { %v1113_v52 = vpop.f32.mrb[32].mxu1 }
 0x44d   :  { %v3766_v54 = vadd.f32 %v1113_v52, %v164_v8  ;;  %554 = vmax.xlane.f32.xlu0 %v553_v53  ;;  %v2881_v55 = vpop.f32.mrb[33].mxu1 }
 0x44e   :  { %v1116_v56 = vpop.f32.mrb[34].mxu1  ;;  %v461_v55 = vsel %vm349_vm3, %v3776_v4, 0 }
 0x44f   :  { %v2882_v57 = vpop.f32.mrb[35].mxu1  ;;  %v1119_v58 = vsel %vm285_vm2, %v3766_v54, -inf }
 0x450   :  { %1120 = vmax.xlane.f32.xlu1 %v1119_v58 }
 0x451   :  { %664 = vmax.xlane.f32.xlu0 %v663_v60 }
 0x455   :  { %790 = vmax.xlane.f32.xlu0 %v789_v61 }
 0x459   :  { %1010 = vmax.xlane.f32.xlu0 %v1009_v62 }
 0x46f   :  { %565 = vrot.lane.b32.xlu0 %v3675_v46, %s3417_s24 }
 0x4a5   :  { %v334_v63 = vpop.xlane.xlu0 %333 }
 0x4a6   :  { %v335_v2 = vsub.f32 %v327_v10, %v334_v63 }
 0x4a8   :  { %v336_v3 = vmul.f32 1.442695, %v335_v2 }
 0x4a9   :  { %v345_v5 = vpop.permute.xlu0 %344 }
 0x4aa   :  { %3114 = vpow2.f32 %v336_v3  ;;  %v351_v6 = vsel %vm349_vm3, %v345_v5, 0 }
 0x4ab   :  { %2800 = vmatpush3.bf16.msra.mxu0 %v351_v6 }
 0x4ac   :  { %2811 = vmatprep.subr.bf16.mxu0 %v3406_v15 }
 0x4ad   :  { %v445_v7 = vpop.xlane.xlu1 %444 }
 0x4ae   :  { %v446_v8 = vsub.f32 %v3753_v17, %v445_v7 }
 0x4b0   :  { %v447_v9 = vmul.f32 1.442695, %v446_v8 }
 0x4b2   :  { %3116 = vpow2.f32 %v447_v9 }
 0x4b4   :  { %v3115_v11 = vpop.eup %3114 }
 0x4b5   :  { %v338_v12 = vsel %vm285_vm2, %v3115_v11, 0.0 }
 0x4b6   :  { %339 = vadd.xlane.f32.xlu0 %v338_v12 }
 0x4bc   :  { %v3782_v10 = vpop.eup %3116 }
 0x4bd   :  { %v449_v13 = vsel %vm285_vm2, %v3782_v10, 0.0 }
 0x4be   :  { %450 = vadd.xlane.f32.xlu1 %v449_v13 }
 0x4cd   :  { %v901_v21 = vpop.xlane.xlu1 %900 }
 0x4ce   :  { %v902_v25 = vsub.f32 %v3759_v38, %v901_v21 }
 0x4cf   :  { %801 = vrot.lane.b32.xlu1 %v3690_v47, %s3416_s4 }
 0x4d0   :  { %v903_v29 = vmul.f32 1.442695, %v902_v25 }
 0x4da   :  { %v555_v14 = vpop.xlane.xlu0 %554 }
 0x4db   :  { %v556_v16 = vsub.f32 %v548_v50, %v555_v14 }
 0x4dd   :  { %v557_v18 = vmul.f32 1.442695, %v556_v16  ;;  %v1121_v41 = vpop.xlane.xlu1 %1120 }
 0x4de   :  { %v665_v19 = vpop.xlane.xlu0 %664  ;;  %v1122_v42 = vsub.f32 %v3766_v54, %v1121_v41 }
 0x4df   :  { %3118 = vpow2.f32 %v557_v18  ;;  %v666_v17 = vsub.f32 %v658_v51, %v665_v19 }
 0x4e0   :  { %v1123_v45 = vmul.f32 1.442695, %v1122_v42 }
 0x4e1   :  { %v667_v20 = vmul.f32 1.442695, %v666_v17 }
 0x4e2   :  { %v791_v22 = vpop.xlane.xlu0 %790 }
 0x4e3   :  { %v792_v23 = vsub.f32 %v784_v59, %v791_v22  ;;  %3120 = vpow2.f32 %v667_v20 }
 0x4e5   :  { %v793_v27 = vmul.f32 1.442695, %v792_v23 }
 0x4e6   :  { %v1011_v38 = vpop.xlane.xlu0 %1010 }
 0x4e7   :  { %3122 = vpow2.f32 %v793_v27  ;;  %v1012_v39 = vsub.f32 %v3763_v44, %v1011_v38 }
 0x4e8   :  { %3124 = vpow2.f32 %v903_v29 }
 0x4e9   :  { %v3119_v28 = vpop.eup %3118  ;;  %v1013_v40 = vmul.f32 1.442695, %v1012_v39 }
 0x4ea   :  { %v559_v31 = vsel %vm285_vm2, %v3119_v28, 0.0  ;;  %v566_v49 = vpop.permute.xlu0 %565 }
 0x4eb   :  { %560 = vadd.xlane.f32.xlu0 %v559_v31  ;;  %3126 = vpow2.f32 %v1013_v40  ;;  %v571_v58 = vsel %vm349_vm3, %v566_v49, 0 }
 0x4ec   :  { %3128 = vpow2.f32 %v1123_v45 }
 0x4ed   :  { %v3790_v32 = vpop.eup %3120 }
 0x4ee   :  { %v669_v33 = vsel %vm285_vm2, %v3790_v32, 0.0 }
 0x4f1   :  { %v3794_v34 = vpop.eup %3122 }
 0x4f2   :  { %v795_v35 = vsel %vm285_vm2, %v3794_v34, 0.0  ;;  %v3798_v36 = vpop.eup %3124 }
 0x4f3   :  { %670 = vadd.xlane.f32.xlu1 %v669_v33  ;;  %v905_v37 = vsel %vm285_vm2, %v3798_v36, 0.0 }
 0x4f5   :  { %v3807_v43 = vpop.eup %3126 }
 0x4f6   :  { %v1015_v48 = vsel %vm285_vm2, %v3807_v43, 0.0 }
 0x4f7   :  { %796 = vadd.xlane.f32.xlu1 %v795_v35 }
 0x4fb   :  { %906 = vadd.xlane.f32.xlu1 %v905_v37 }
 0x501   :  { %675 = vrot.lane.b32.xlu0 %v3675_v46, %s3418_s22  ;;  %v3811_v46 = vpop.eup %3128 }
 0x502   :  { %v1125_v44 = vsel %vm285_vm2, %v3811_v46, 0.0 }
 0x50c   :  { %911 = vrot.lane.b32.xlu1 %v3690_v47, %s3415_s0 }
 0x520   :  { %1016 = vadd.xlane.f32.xlu0 %v1015_v48 }
 0x530   :  { %1126 = vadd.xlane.f32.xlu1 %v1125_v44 }
 0x536   :  { %1021 = vrot.lane.b32.xlu0 %v3690_v47, %s3417_s24  ;;  %s4216_s24 = sld [smem:[#allocation24_spill]] }
 0x541   :  { %1131 = vrot.lane.b32.xlu1 %v3690_v47, %s3418_s22 }
 0x543   :  { %v340_v50 = vpop.xlane.xlu0 %339 }
 0x544   :  { %3130 = vrcp.f32 %v340_v50 }
 0x54b   :  { %v451_v51 = vpop.xlane.xlu1 %450 }
 0x54c   :  { %3132 = vrcp.f32 %v451_v51 }
 0x54e   :  { %v3131_v52 = vpop.eup %3130 }
 0x54f   :  { %v342_v53 = vmul.f32 %v3131_v52, %v3115_v11  ;;  %v802_v60 = vpop.permute.xlu1 %801 }
 0x550   :  { %v807_v12 = vsel %vm349_vm3, %v802_v60, 0  ;;  %v3095_v60 = vld [vmem:[%s4188_s6] sm:$0xff]  }
 0x551   :  { %v343_v54 = vpack.c.bf16 %v342_v53, %v342_v53  ;;  %2890 = vmatpush3.bf16.msra.mxu1 %v3095_v60  ;;  %v1287_v60 = vsub.s32 1, %v3657_v24 }
 0x552   :  { %2891 = vmatprep.subr.bf16.mxu1 %v3406_v15 }
 0x553   :  { %2802 = vmatmul.mubr.msk.bf16.vlgmr.msra.gmra.mrb[0].mxu0 %vm285_vm2, %v343_v54 }
 0x554   :  { %2812 = vmatpush3.bf16.msra.mxu0 %v461_v55  ;;  %2813 = vmatprep.mubr.msk.bf16.mxu0 %vm3407_vm1, %v3406_v15 }
 0x555   :  { %2823 = vmatprep.subr.bf16.mxu0 %v3406_v15 }
 0x556   :  { %v3133_v56 = vpop.eup %3132 }
 0x557   :  { %v453_v47 = vmul.f32 %v3133_v56, %v3782_v10 }
 0x559   :  { %v454_v57 = vpack.c.bf16 %v453_v47, %v453_v47 }
 0x55b   :  { %2814 = vmatmul.mubr.msk.bf16.vlgmr.msra.gmra.mrb[4].mxu0 %vm285_vm2, %v454_v57 }
 0x55c   :  { %2824 = vmatpush3.bf16.msra.mxu0 %v571_v58  ;;  %2825 = vmatprep.mubr.msk.bf16.mxu0 %vm3407_vm1, %v3406_v15 }
 0x55d   :  { %2835 = vmatprep.subr.bf16.mxu0 %v3406_v15 }
 0x578   :  { %v561_v59 = vpop.xlane.xlu0 %560 }
 0x579   :  { %3134 = vrcp.f32 %v561_v59 }
 0x57c   :  { %v676_v3 = vpop.permute.xlu0 %675 }
 0x57d   :  { %v681_v5 = vsel %vm349_vm3, %v676_v3, 0 }
 0x580   :  { %v671_v61 = vpop.xlane.xlu1 %670 }
 0x581   :  { %3136 = vrcp.f32 %v671_v61 }
 0x583   :  { %v3135_v62 = vpop.eup %3134 }
 0x584   :  { %v563_v63 = vmul.f32 %v3135_v62, %v3119_v28  ;;  %v797_v2 = vpop.xlane.xlu1 %796 }
 0x585   :  { %3138 = vrcp.f32 %v797_v2 }
 0x586   :  { %v564_v4 = vpack.c.bf16 %v563_v63, %v563_v63 }
 0x588   :  { %2826 = vmatmul.mubr.msk.bf16.vlgmr.msra.gmra.mrb[8].mxu0 %vm285_vm2, %v564_v4  ;;  %v907_v6 = vpop.xlane.xlu1 %906  ;;  %v3096_v4 = vld [vmem:[%s4188_s6 + $0x8] sm:$0xff]  }
 0x589   :  { %2836 = vmatpush3.bf16.msra.mxu0 %v681_v5  ;;  %2837 = vmatprep.mubr.msk.bf16.mxu0 %vm3407_vm1, %v3406_v15  ;;  %3140 = vrcp.f32 %v907_v6 }
 0x58a   :  { %2847 = vmatprep.subr.bf16.mxu0 %v3406_v15  ;;  %2892 = vmatpush3.bf16.msra.mxu1 %v3096_v4 }
 0x58b   :  { %v3137_v7 = vpop.eup %3136  ;;  %2905 = vmatprep.subr.bf16.mxu1 %v3406_v15 }
 0x58c   :  { %v673_v8 = vmul.f32 %v3137_v7, %v3790_v32  ;;  %v912_v13 = vpop.permute.xlu1 %911 }
 0x58d   :  { %v917_v18 = vsel %vm349_vm3, %v912_v13, 0 }
 0x58e   :  { %v674_v9 = vpack.c.bf16 %v673_v8, %v673_v8 }
 0x58f   :  { %v3139_v11 = vpop.eup %3138 }
 0x590   :  { %2838 = vmatmul.mubr.msk.bf16.vlgmr.msra.gmra.mrb[12].mxu0 %vm285_vm2, %v674_v9  ;;  %v799_v10 = vmul.f32 %v3139_v11, %v3794_v34 }
 0x591   :  { %2848 = vmatpush3.bf16.msra.mxu0 %v807_v12  ;;  %2849 = vmatprep.mubr.msk.bf16.mxu0 %vm3407_vm1, %v3406_v15 }
 0x592   :  { %2859 = vmatprep.subr.bf16.mxu0 %v3406_v15  ;;  %v800_v14 = vpack.c.bf16 %v799_v10, %v799_v10 }
 0x593   :  { %v3141_v16 = vpop.eup %3140 }
 0x594   :  { %v909_v19 = vmul.f32 %v3141_v16, %v3798_v36 }
 0x596   :  { %v910_v17 = vpack.c.bf16 %v909_v19, %v909_v19 }
 0x598   :  { %2850 = vmatmul.mubr.msk.bf16.vlgmr.msra.gmra.mrb[16].mxu0 %vm285_vm2, %v800_v14 }
 0x599   :  { %2860 = vmatpush3.bf16.msra.mxu0 %v917_v18  ;;  %2861 = vmatprep.mubr.msk.bf16.mxu0 %vm3407_vm1, %v3406_v15 }
 0x59a   :  { %2871 = vmatprep.subr.bf16.mxu0 %v3406_v15 }
 0x5a0   :  { %2862 = vmatmul.mubr.msk.bf16.vlgmr.msra.gmra.mrb[20].mxu0 %vm285_vm2, %v910_v17 }
 0x5a1   :  { %2873 = vmatprep.mubr.msk.bf16.mxu0 %vm3407_vm1, %v3406_v15 }
 0x5ad   :  { %v1017_v20 = vpop.xlane.xlu0 %1016 }
 0x5ae   :  { %3142 = vrcp.f32 %v1017_v20 }
 0x5b1   :  { %v1022_v21 = vpop.permute.xlu0 %1021 }
 0x5b2   :  { %v1027_v22 = vsel %vm349_vm3, %v1022_v21, 0 }
 0x5b3   :  { %2872 = vmatpush3.bf16.msra.mxu0 %v1027_v22 }
 0x5b4   :  { %2883 = vmatprep.subr.bf16.mxu0 %v3406_v15 }
 0x5b8   :  { %v3143_v23 = vpop.eup %3142 }
 0x5b9   :  { %v1019_v25 = vmul.f32 %v3143_v23, %v3807_v43 }
 0x5bb   :  { %v1020_v27 = vpack.c.bf16 %v1019_v25, %v1019_v25 }
 0x5bd   :  { %2874 = vmatmul.mubr.msk.bf16.vlgmr.msra.gmra.mrb[24].mxu0 %vm285_vm2, %v1020_v27  ;;  %v1127_v28 = vpop.xlane.xlu1 %1126 }
 0x5be   :  { %3144 = vrcp.f32 %v1127_v28  ;;  %2885 = vmatprep.mubr.msk.bf16.mxu0 %vm3407_vm1, %v3406_v15 }
 0x5c1   :  { %v1132_v29 = vpop.permute.xlu1 %1131 }
 0x5c2   :  { %v1137_v31 = vsel %vm349_vm3, %v1132_v29, 0  ;;  %v2655_v29 = vld [vmem:[#allocation8] ss:$0 sm:$0xff] }
 0x5c3   :  { %2884 = vmatpush3.bf16.msra.mxu0 %v1137_v31 }
 0x5c4   :  { %2897 = vmatprep.subr.bf16.mxu0 %v3406_v15 }
 0x5c8   :  { %v3145_v32 = vpop.eup %3144 }
 0x5c9   :  { %v1129_v33 = vmul.f32 %v3145_v32, %v3811_v46 }
 0x5cb   :  { %v1130_v34 = vpack.c.bf16 %v1129_v33, %v1129_v33 }
 0x5cd   :  { %2886 = vmatmul.mubr.msk.bf16.vlgmr.msra.gmra.mrb[28].mxu0 %vm285_vm2, %v1130_v34 }
 0x5ce   :  { %2901 = vmatprep.mubr.msk.bf16.mxu0 %vm3407_vm1, %v3406_v15 }
 0x626   :  { %v387_v35 = vpop.f32.mrb[0].mxu0 }
 0x627   :  { %v2803_v36 = vpop.f32.mrb[1].mxu0 }
 0x628   :  { %v390_v37 = vpop.f32.mrb[2].mxu0 }
 0x629   :  { %v2804_v38 = vpop.f32.mrb[3].mxu0 }
 0x62e   :  { %v497_v39 = vpop.f32.mrb[4].mxu0 }
 0x62f   :  { %v2815_v40 = vpop.f32.mrb[5].mxu0 }
 0x630   :  { %v500_v41 = vpop.f32.mrb[6].mxu0 }
 0x631   :  { %v2816_v42 = vpop.f32.mrb[7].mxu0 }
 0x65b   :  { %v607_v43 = vpop.f32.mrb[8].mxu0 }
 0x65c   :  { %v2827_v45 = vpop.f32.mrb[9].mxu0 }
 0x65d   :  { %v610_v48 = vpop.f32.mrb[10].mxu0 }
 0x65e   :  { %v2828_v44 = vpop.f32.mrb[11].mxu0 }
 0x663   :  { %v717_v49 = vpop.f32.mrb[12].mxu0 }
 0x664   :  { %v2839_v46 = vpop.f32.mrb[13].mxu0 }
 0x665   :  { %v720_v50 = vpop.f32.mrb[14].mxu0 }
 0x666   :  { %v2840_v51 = vpop.f32.mrb[15].mxu0  ;;  %v3097_v50 = vld [vmem:[%s4192_s10] sm:$0xff]  }
 0x667   :  { %v3098_v51 = vld [vmem:[%s4192_s10 + $0x8] sm:$0xff]  }
 0x66b   :  { %v843_v52 = vpop.f32.mrb[16].mxu0 }
 0x66c   :  { %v2851_v53 = vpop.f32.mrb[17].mxu0 }
 0x66d   :  { %v846_v54 = vpop.f32.mrb[18].mxu0  ;;  %v3100_v53 = vld [vmem:[%s4190_s8] sm:$0xff]  }
 0x66e   :  { %v2852_v55 = vpop.f32.mrb[19].mxu0  ;;  %2898 = vmatpush3.bf16.msra.mxu0 %v3100_v53  ;;  %v3101_v54 = vld [vmem:[%s4190_s8 + $0x8] sm:$0xff]  }
 0x66f   :  { %2899 = vmatprep.subr.bf16.mxu0 %v3406_v15 }
 0x672   :  { %2900 = vmatpush3.bf16.msra.mxu0 %v3101_v54 }
 0x673   :  { %v953_v56 = vpop.f32.mrb[20].mxu0  ;;  %2913 = vmatprep.subr.bf16.mxu0 %v3406_v15 }
 0x674   :  { %v3063_v47 = vpack.i.bf16 %v953_v56, %v497_v39  ;;  %v2863_v57 = vpop.f32.mrb[21].mxu0 }
 0x675   :  { %v956_v58 = vpop.f32.mrb[22].mxu0 }
 0x676   :  { %3064 = vrot.lane.b32.xlu0 %v3063_v47, %s3419_s9  ;;  %v2864_v59 = vpop.f32.mrb[23].mxu0 }
 0x690   :  { %v1063_v61 = vpop.f32.mrb[24].mxu0 }
 0x691   :  { %v3068_v62 = vpack.i.bf16 %v1063_v61, %v607_v43  ;;  %v2875_v63 = vpop.f32.mrb[25].mxu0 }
 0x692   :  { %v1066_v2 = vpop.f32.mrb[26].mxu0 }
 0x693   :  { %3069 = vrot.lane.b32.xlu1 %v3068_v62, %s3420_s29  ;;  %v2876_v3 = vpop.f32.mrb[27].mxu0  ;;  %v1288_v62 = vrot.slane %v3663_v26, %v1287_v60 }
 0x6a0   :  { %v1173_v5 = vpop.f32.mrb[28].mxu0 }
 0x6a1   :  { %v3073_v6 = vpack.i.bf16 %v1173_v5, %v717_v49  ;;  %v2887_v7 = vpop.f32.mrb[29].mxu0  ;;  %v1294_v5 = vrot.slane %v3669_v30, %v1287_v60 }
 0x6a2   :  { %v1176_v8 = vpop.f32.mrb[30].mxu0 }
 0x6a3   :  { %3074 = vrot.lane.b32.xlu0 %v3073_v6, %s3421_s23  ;;  %v2888_v9 = vpop.f32.mrb[31].mxu0 }
 0x6e8   :  { %v3065_v11 = vpop.permute.xlu0 %3064 }
 0x6e9   :  { %v3067_v10 = vunpack.i.h.bf16 %v3065_v11  ;;  %v3066_v13 = vunpack.i.l.bf16 %v3065_v11  ;;  %v2663_v11 = vld [vmem:[#allocation11] ss:$0 sm:$0xff] }
 0x6eb   :  { %v1191_v19 = vsel %vm285_vm2, %v843_v52, %v3067_v10  ;;  %v735_v17 = vsel %vm285_vm2, %v387_v35, %v3066_v13  ;;  %v3099_v52 = vld [vmem:[%s4216_s24] sm:$0xff]  }
 0x705   :  { %v3070_v12 = vpop.permute.xlu1 %3069 }
 0x706   :  { %v3072_v14 = vunpack.i.h.bf16 %v3070_v12  ;;  %v3071_v16 = vunpack.i.l.bf16 %v3070_v12 }
 0x708   :  { %v1192_v22 = vsel %vm736_vm4, %v1191_v19, %v3072_v14  ;;  %v737_v23 = vsel %vm736_vm4, %v735_v17, %v3071_v16  ;;  %v2659_v19 = vld [vmem:[#allocation10] ss:$0 sm:$0xff] }
 0x715   :  { %v3075_v18 = vpop.permute.xlu0 %3074 }
 0x716   :  { %v3077_v20 = vunpack.i.h.bf16 %v3075_v18  ;;  %v3076_v21 = vunpack.i.l.bf16 %v3075_v18 }
 0x718   :  { %v739_v25 = vsel %vm738_vm5, %v737_v23, %v3076_v21  ;;  %v1193_v27 = vsel %vm738_vm5, %v1192_v22, %v3077_v20 }
 0x719   :  { %v1194_v28 = vpack.c.bf16 %v1193_v27, %v739_v25 }
 0x71b   :  { %2894 = vmatmul.mubr.msk.bf16.vlgmr.msra.gmra.mrb[36].mxu1 %vm168_vm0, %v1194_v28 }
 0x71c   :  { %2909 = vmatprep.mubr.msk.bf16.mxu1 %vm3407_vm1, %v3406_v15  ;;  %2906 = vmatpush3.bf16.msra.mxu1 %v3097_v50 }
 0x71d   :  { %2907 = vmatprep.subr.bf16.mxu1 %v3406_v15 }
 0x720   :  { %2908 = vmatpush3.bf16.msra.mxu1 %v3098_v51  ;;  %v165_v51 = vld [vmem:[#allocation5] sm:$0xff] }
 0x721   :  { %2919 = vmatprep.subr.bf16.mxu1 %v3406_v15 }
 0x723   :  { %2910 = vmatmul.mubr.msk.bf16.vlgmr.msra.gmra.mrb[40].mxu1 %vm168_vm0, %v3099_v52 }
 0x724   :  { %2921 = vmatprep.mubr.msk.bf16.mxu1 %vm3407_vm1, %v3406_v15 }
 0x7ee   :  { %v1250_v31 = vpop.f32.mrb[36].mxu1 }
 0x7ef   :  { %v1251_v32 = vadd.f32 %v2655_v29, %v1250_v31  ;;  %v2895_v33 = vpop.f32.mrb[37].mxu1 }
 0x7f0   :  { %v1253_v34 = vpop.f32.mrb[38].mxu1 }
 0x7f1   :  { %v3884_v35 = vadd.f32 %v1251_v32, %v3628_v0  ;;  %v1254_v36 = vadd.f32 %v2655_v29, %v1253_v34  ;;  %v2896_v37 = vpop.f32.mrb[39].mxu1 }
 0x7f3   :  { %v3887_v38 = vadd.f32 %v1254_v36, %v3633_v1  ;;  %v1259_v39 = vsel %vm168_vm0, %v3884_v35, 0.0 }
 0x7f4   :  { %1260 = vadd.xlane.f32.xlu1 %v1259_v39 }
 0x7f5   :  { %v1262_v40 = vsel %vm168_vm0, %v3887_v38, 0.0 }
 0x7f6   :  { %1263 = vadd.xlane.f32.xlu0 %v1262_v40  ;;  %v1430_v12 = vpop.f32.mrb[40].mxu1 }
 0x7f7   :  { %v1431_v10 = vadd.f32 %v2663_v11, %v1430_v12  ;;  %v2911_v13 = vpop.f32.mrb[41].mxu1 }
 0x7f8   :  { %v1433_v26 = vpop.f32.mrb[42].mxu1 }
 0x7f9   :  { %v1434_v14 = vadd.f32 %v2663_v11, %v1433_v26  ;;  %v2912_v16 = vpop.f32.mrb[43].mxu1 }
 0x7fb   :  { %v3925_v18 = vpack.c.bf16 %v1434_v14, %v1431_v10 }
 0x7fd   :  { %v1448_v30 = vsel %vm285_vm2, %v3925_v18, 0  ;;  %v3945_v32 = vrot.slane %v3925_v18, 4 }
 0x805   :  { %1554 = vrot.lane.b32.xlu1 %v3925_v18, %s3410_s26 }
 0x809   :  { %1664 = vrot.lane.b32.xlu1 %v3925_v18, %s3411_s28 }
 0x881   :  { %v1261_v41 = vpop.xlane.xlu1 %1260 }
 0x882   :  { %v1265_v42 = vmul.f32 0.03125, %v1261_v41 }
 0x883   :  { %v1264_v43 = vpop.xlane.xlu0 %1263 }
 0x884   :  { %v1267_v45 = vsub.f32 %v3884_v35, %v1265_v42  ;;  %v1266_v0 = vmul.f32 0.03125, %v1264_v43  ;;  %v1903_v42 = vsel %vm285_vm2, %v3945_v32, 0 }
 0x885   :  { %v1555_v28 = vpop.permute.xlu1 %1554 }
 0x886   :  { %v1268_v48 = vsub.f32 %v3887_v38, %v1266_v0  ;;  %v1269_v44 = vmul.f32 %v1267_v45, %v1267_v45  ;;  %v1560_v29 = vsel %vm285_vm2, %v1555_v28, 0 }
 0x888   :  { %v1271_v1 = vsel %vm168_vm0, %v1269_v44, 0.0  ;;  %v1270_v49 = vmul.f32 %v1268_v48, %v1268_v48 }
 0x889   :  { %1272 = vadd.xlane.f32.xlu0 %v1271_v1  ;;  %v1665_v33 = vpop.permute.xlu1 %1664 }
 0x88a   :  { %v1274_v46 = vsel %vm168_vm0, %v1270_v49, 0.0  ;;  %v1670_v37 = vsel %vm285_vm2, %v1665_v33, 0 }
 0x88d   :  { %1275 = vadd.xlane.f32.xlu0 %v1274_v46 }
 0x916   :  { %v1273_v55 = vpop.xlane.xlu0 %1272 }
 0x917   :  { %v1277_v56 = vmul.f32 0.03125, %v1273_v55 }
 0x919   :  { %v1279_v47 = vadd.f32 1e-05, %v1277_v56 }
 0x91a   :  { %v1276_v57 = vpop.xlane.xlu0 %1275 }
 0x91b   :  { %3146 = vrsqrt.f32 %v1279_v47  ;;  %v1278_v58 = vmul.f32 0.03125, %v1276_v57 }
 0x91d   :  { %v1280_v59 = vadd.f32 1e-05, %v1278_v58 }
 0x91f   :  { %3148 = vrsqrt.f32 %v1280_v59 }
 0x925   :  { %v3147_v61 = vpop.eup %3146 }
 0x926   :  { %v1283_v63 = vmul.f32 %v3147_v61, %v1267_v45 }
 0x928   :  { %v1289_v3 = vmul.f32 %v1288_v62, %v1283_v63 }
 0x929   :  { %v3149_v2 = vpop.eup %3148 }
 0x92a   :  { %v1284_v4 = vmul.f32 %v3149_v2, %v1268_v48  ;;  %v1295_v7 = vadd.f32 %v1294_v5, %v1289_v3 }
 0x92c   :  { %v1290_v6 = vmul.f32 %v1288_v62, %v1284_v4 }
 0x92e   :  { %v1296_v8 = vadd.f32 %v1294_v5, %v1290_v6 }
 0x930   :  { %v1297_v9 = vpack.c.bf16 %v1296_v8, %v1295_v7 }
 0x932   :  { %2902 = vmatmul.mubr.msk.bf16.vlgmr.msra.gmra.mrb[32].mxu0 %vm168_vm0, %v1297_v9 }
 0x933   :  { %2915 = vmatprep.mubr.msk.bf16.mxu0 %vm3407_vm1, %v3406_v15  ;;  %2914 = vmatpush3.bf16.xpose.msra.mxu0 %v1448_v30 }
 0x934   :  { %2925 = vmatprep.subr.bf16.mxu0 %v3406_v15 }
 0xa05   :  { %v1358_v17 = vpop.f32.mrb[32].mxu0 }
 0xa06   :  { %v2903_v20 = vpop.f32.mrb[33].mxu0  ;;  %v1359_v22 = vadd.f32 %v2659_v19, %v1358_v17 }
 0xa07   :  { %v1361_v21 = vpop.f32.mrb[34].mxu0 }
 0xa08   :  { %v1362_v23 = vadd.f32 %v2659_v19, %v1361_v21  ;;  %v2904_v25 = vpop.f32.mrb[35].mxu0 }
 0xa0a   :  { %v1442_v27 = vpack.c.bf16 %v1362_v23, %v1359_v22 }
 0xa0c   :  { %1552 = vrot.lane.b32.xlu0 %v1442_v27, %s3410_s26  ;;  %1662 = vrot.lane.b32.xlu1 %v1442_v27, %s3411_s28  ;;  %v1897_v31 = vrot.slane %v1442_v27, 4 }
 0xa0d   :  { %2916 = vmatmul.mubr.msk.bf16.vlgmr.msra.gmra.mrb[36].mxu0 %vm285_vm2, %v1442_v27 }
 0xa0e   :  { %2926 = vmatpush3.bf16.xpose.msra.mxu0 %v1560_v29  ;;  %2927 = vmatprep.mubr.msk.bf16.mxu0 %vm3407_vm1, %v3406_v15 }
 0xa0f   :  { %2937 = vmatprep.subr.bf16.mxu0 %v3406_v15 }
 0xa10   :  { %1772 = vrot.lane.b32.xlu0 %v1442_v27, %s3413_s13  ;;  %1774 = vrot.lane.b32.xlu1 %v3925_v18, %s3413_s13 }
 0xa14   :  { %2005 = vrot.lane.b32.xlu0 %v1897_v31, %s3410_s26  ;;  %2007 = vrot.lane.b32.xlu1 %v3945_v32, %s3410_s26 }
 0xa18   :  { %2115 = vrot.lane.b32.xlu0 %v1897_v31, %s3411_s28  ;;  %2117 = vrot.lane.b32.xlu1 %v3945_v32, %s3411_s28 }
 0xa1c   :  { %2225 = vrot.lane.b32.xlu0 %v1897_v31, %s3413_s13  ;;  %2227 = vrot.lane.b32.xlu1 %v3945_v32, %s3413_s13 }
 0xa7e   :  { %v1553_v34 = vpop.permute.xlu0 %1552  ;;  %v1663_v36 = vpop.permute.xlu1 %1662 }
 0xa7f   :  { %2928 = vmatmul.mubr.msk.bf16.vlgmr.msra.gmra.mrb[40].mxu0 %vm285_vm2, %v1553_v34 }
 0xa80   :  { %2938 = vmatpush3.bf16.xpose.msra.mxu0 %v1670_v37  ;;  %2939 = vmatprep.mubr.msk.bf16.mxu0 %vm3407_vm1, %v3406_v15 }
 0xa81   :  { %2949 = vmatprep.subr.bf16.mxu0 %v3406_v15 }
 0xa82   :  { %v1775_v39 = vpop.permute.xlu1 %1774  ;;  %v1773_v41 = vpop.permute.xlu0 %1772 }
 0xa83   :  { %v1780_v40 = vsel %vm285_vm2, %v1775_v39, 0 }
 0xa86   :  { %v2008_v43 = vpop.permute.xlu1 %2007  ;;  %v2006_v48 = vpop.permute.xlu0 %2005 }
 0xa87   :  { %2940 = vmatmul.mubr.msk.bf16.vlgmr.msra.gmra.mrb[44].mxu0 %vm285_vm2, %v1663_v36  ;;  %v2013_v45 = vsel %vm285_vm2, %v2008_v43, 0 }
 0xa88   :  { %2950 = vmatpush3.bf16.xpose.msra.mxu0 %v1780_v40  ;;  %2951 = vmatprep.mubr.msk.bf16.mxu0 %vm3407_vm1, %v3406_v15 }
 0xa89   :  { %2961 = vmatprep.subr.bf16.mxu0 %v3406_v15 }
 0xa8a   :  { %v2118_v0 = vpop.permute.xlu1 %2117  ;;  %v2116_v49 = vpop.permute.xlu0 %2115 }
 0xa8b   :  { %v2123_v44 = vsel %vm285_vm2, %v2118_v0, 0 }
 0xa8e   :  { %v2228_v1 = vpop.permute.xlu1 %2227  ;;  %v2226_v50 = vpop.permute.xlu0 %2225 }
 0xa8f   :  { %2952 = vmatmul.mubr.msk.bf16.vlgmr.msra.gmra.mrb[48].mxu0 %vm285_vm2, %v1773_v41  ;;  %v2233_v46 = vsel %vm285_vm2, %v2228_v1, 0 }
 0xa90   :  { %2962 = vmatpush3.bf16.xpose.msra.mxu0 %v1903_v42  ;;  %2963 = vmatprep.mubr.msk.bf16.mxu0 %vm3407_vm1, %v3406_v15 }
 0xa91   :  { %2973 = vmatprep.subr.bf16.mxu0 %v3406_v15 }
 0xa97   :  { %2964 = vmatmul.mubr.msk.bf16.vlgmr.msra.gmra.mrb[52].mxu0 %vm285_vm2, %v1897_v31 }
 0xa98   :  { %2974 = vmatpush3.bf16.xpose.msra.mxu0 %v2013_v45  ;;  %2975 = vmatprep.mubr.msk.bf16.mxu0 %vm3407_vm1, %v3406_v15 }
 0xa99   :  { %2985 = vmatprep.subr.bf16.mxu0 %v3406_v15 }
 0xa9f   :  { %2976 = vmatmul.mubr.msk.bf16.vlgmr.msra.gmra.mrb[56].mxu0 %vm285_vm2, %v2006_v48 }
 0xaa0   :  { %2986 = vmatpush3.bf16.xpose.msra.mxu0 %v2123_v44  ;;  %2987 = vmatprep.mubr.msk.bf16.mxu0 %vm3407_vm1, %v3406_v15 }
 0xaa1   :  { %2997 = vmatprep.subr.bf16.mxu0 %v3406_v15 }
 0xaa7   :  { %2988 = vmatmul.mubr.msk.bf16.vlgmr.msra.gmra.mrb[60].mxu0 %vm285_vm2, %v2116_v49 }
 0xaa8   :  { %2998 = vmatpush3.bf16.xpose.msra.mxu0 %v2233_v46  ;;  %2999 = vmatprep.mubr.msk.bf16.mxu0 %vm3407_vm1, %v3406_v15 }
 0xaa9   :  { %3009 = vmatprep.subr.bf16.mxu0 %v3406_v15 }
 0xaaf   :  { %3000 = vmatmul.mubr.msk.bf16.vlgmr.msra.gmra.mrb[64].mxu0 %vm285_vm2, %v2226_v50 }
 0xab0   :  { %3013 = vmatprep.mubr.msk.bf16.mxu0 %vm3407_vm1, %v3406_v15 }
 0xae0   :  { %v1484_v52 = vpop.f32.mrb[36].mxu0 }
 0xae1   :  { %v1485_v53 = vadd.f32 %v1484_v52, %v165_v51  ;;  %v2917_v54 = vpop.f32.mrb[37].mxu0 }
 0xae2   :  { %v1487_v55 = vpop.f32.mrb[38].mxu0 }
 0xae3   :  { %v2918_v56 = vpop.f32.mrb[39].mxu0  ;;  %v1490_v47 = vsel %vm285_vm2, %v1485_v53, -inf }
 0xae4   :  { %1491 = vmax.xlane.f32.xlu1 %v1490_v47 }
 0xb52   :  { %v1596_v57 = vpop.f32.mrb[40].mxu0 }
 0xb53   :  { %v1597_v58 = vadd.f32 %v1596_v57, %v165_v51  ;;  %v2929_v59 = vpop.f32.mrb[41].mxu0 }
 0xb54   :  { %v1599_v60 = vpop.f32.mrb[42].mxu0 }
 0xb55   :  { %v2930_v61 = vpop.f32.mrb[43].mxu0  ;;  %v1602_v62 = vsel %vm285_vm2, %v1597_v58, -inf }
 0xb56   :  { %1603 = vmax.xlane.f32.xlu0 %v1602_v62 }
 0xb5a   :  { %v1706_v63 = vpop.f32.mrb[44].mxu0 }
 0xb5b   :  { %v1707_v2 = vadd.f32 %v1706_v63, %v165_v51  ;;  %v2941_v3 = vpop.f32.mrb[45].mxu0 }
 0xb5c   :  { %v1709_v4 = vpop.f32.mrb[46].mxu0 }
 0xb5d   :  { %v2942_v5 = vpop.f32.mrb[47].mxu0  ;;  %v1712_v6 = vsel %vm285_vm2, %v1707_v2, -inf }
 0xb5e   :  { %1713 = vmax.xlane.f32.xlu0 %v1712_v6 }
 0xb62   :  { %v1816_v7 = vpop.f32.mrb[48].mxu0 }
 0xb63   :  { %v3993_v8 = vadd.f32 %v1816_v7, %v165_v51  ;;  %v2953_v9 = vpop.f32.mrb[49].mxu0 }
 0xb64   :  { %v1819_v11 = vpop.f32.mrb[50].mxu0 }
 0xb65   :  { %v2954_v12 = vpop.f32.mrb[51].mxu0  ;;  %v1822_v10 = vsel %vm285_vm2, %v3993_v8, -inf }
 0xb66   :  { %1823 = vmax.xlane.f32.xlu0 %v1822_v10 }
 0xb6a   :  { %v1939_v13 = vpop.f32.mrb[52].mxu0 }
 0xb6b   :  { %v3997_v26 = vadd.f32 %v1939_v13, %v165_v51  ;;  %v2965_v14 = vpop.f32.mrb[53].mxu0 }
 0xb6c   :  { %v1942_v16 = vpop.f32.mrb[54].mxu0 }
 0xb6d   :  { %v2966_v30 = vpop.f32.mrb[55].mxu0  ;;  %v1945_v19 = vsel %vm285_vm2, %v3997_v26, -inf }
 0xb6e   :  { %1946 = vmax.xlane.f32.xlu1 %v1945_v19 }
 0xb71   :  { %v1492_v41 = vpop.xlane.xlu1 %1491 }
 0xb72   :  { %v2049_v17 = vpop.f32.mrb[56].mxu0  ;;  %v1493_v42 = vsub.f32 %v1485_v53, %v1492_v41 }
 0xb73   :  { %v2050_v20 = vadd.f32 %v2049_v17, %v165_v51  ;;  %v2977_v21 = vpop.f32.mrb[57].mxu0 }
 0xb74   :  { %v2052_v22 = vpop.f32.mrb[58].mxu0  ;;  %v1494_v43 = vmul.f32 1.442695, %v1493_v42 }
 0xb75   :  { %v2978_v23 = vpop.f32.mrb[59].mxu0  ;;  %v2055_v25 = vsel %vm285_vm2, %v2050_v20, -inf }
 0xb76   :  { %2056 = vmax.xlane.f32.xlu0 %v2055_v25  ;;  %3150 = vpow2.f32 %v1494_v43 }
 0xb7a   :  { %v2159_v27 = vpop.f32.mrb[60].mxu0 }
 0xb7b   :  { %v2160_v28 = vadd.f32 %v2159_v27, %v165_v51  ;;  %v2989_v29 = vpop.f32.mrb[61].mxu0 }
 0xb7c   :  { %v2162_v31 = vpop.f32.mrb[62].mxu0 }
 0xb7d   :  { %v2990_v33 = vpop.f32.mrb[63].mxu0  ;;  %v2165_v34 = vsel %vm285_vm2, %v2160_v28, -inf }
 0xb7e   :  { %2166 = vmax.xlane.f32.xlu1 %v2165_v34 }
 0xb80   :  { %v4008_v48 = vpop.eup %3150 }
 0xb81   :  { %v1496_v44 = vsel %vm285_vm2, %v4008_v48, 0.0 }
 0xb82   :  { %v2269_v36 = vpop.f32.mrb[64].mxu0 }
 0xb83   :  { %v3001_v37 = vpop.f32.mrb[65].mxu0  ;;  %v2270_v45 = vadd.f32 %v2269_v36, %v165_v51 }
 0xb84   :  { %v2272_v39 = vpop.f32.mrb[66].mxu0 }
 0xb85   :  { %v3002_v40 = vpop.f32.mrb[67].mxu0  ;;  %v2275_v0 = vsel %vm285_vm2, %v2270_v45, -inf }
 0xb8c   :  { %1614 = vrot.lane.b32.xlu0 %v3925_v18, %s3408_s25 }
 0xb8f   :  { %1503 = vrot.lane.b32.xlu1 %v3925_v18, %s3409_s1 }
 0xbab   :  { %2276 = vmax.xlane.f32.xlu0 %v2275_v0 }
 0xbb3   :  { %1497 = vadd.xlane.f32.xlu1 %v1496_v44 }
 0xbe3   :  { %v1604_v1 = vpop.xlane.xlu0 %1603 }
 0xbe4   :  { %v1605_v49 = vsub.f32 %v1597_v58, %v1604_v1 }
 0xbe6   :  { %v1606_v46 = vmul.f32 1.442695, %v1605_v49 }
 0xbe8   :  { %3152 = vpow2.f32 %v1606_v46 }
 0xbeb   :  { %v1714_v50 = vpop.xlane.xlu0 %1713 }
 0xbec   :  { %v1715_v52 = vsub.f32 %v1707_v2, %v1714_v50 }
 0xbee   :  { %v1716_v54 = vmul.f32 1.442695, %v1715_v52 }
 0xbf0   :  { %3154 = vpow2.f32 %v1716_v54 }
 0xbf2   :  { %v4012_v53 = vpop.eup %3152 }
 0xbf3   :  { %v1608_v51 = vsel %vm285_vm2, %v4012_v53, 0.0  ;;  %v1824_v59 = vpop.xlane.xlu0 %1823 }
 0xbf4   :  { %1609 = vadd.xlane.f32.xlu0 %v1608_v51  ;;  %v1825_v61 = vsub.f32 %v3993_v8, %v1824_v59 }
 0xbf6   :  { %v1826_v62 = vmul.f32 1.442695, %v1825_v61 }
 0xbf8   :  { %3156 = vpow2.f32 %v1826_v62 }
 0xbfa   :  { %v4016_v55 = vpop.eup %3154 }
 0xbfb   :  { %v1718_v56 = vsel %vm285_vm2, %v4016_v55, 0.0  ;;  %v1947_v47 = vpop.xlane.xlu1 %1946 }
 0xbfc   :  { %1719 = vadd.xlane.f32.xlu1 %v1718_v56  ;;  %v1948_v63 = vsub.f32 %v3997_v26, %v1947_v47 }
 0xbfe   :  { %v1949_v4 = vmul.f32 1.442695, %v1948_v63 }
 0xc00   :  { %3158 = vpow2.f32 %v1949_v4 }
 0xc02   :  { %v3157_v7 = vpop.eup %3156 }
 0xc03   :  { %v2057_v2 = vpop.xlane.xlu0 %2056  ;;  %v1828_v9 = vsel %vm285_vm2, %v3157_v7, 0.0 }
 0xc04   :  { %v2058_v3 = vsub.f32 %v2050_v20, %v2057_v2 }
 0xc06   :  { %v2059_v6 = vmul.f32 1.442695, %v2058_v3 }
 0xc07   :  { %v1615_v14 = vpop.permute.xlu0 %1614 }
 0xc08   :  { %3160 = vpow2.f32 %v2059_v6  ;;  %v1620_v27 = vsel %vm349_vm3, %v1615_v14, 0 }
 0xc0a   :  { %1724 = vrot.lane.b32.xlu0 %v3925_v18, %s3412_s11  ;;  %v4029_v11 = vpop.eup %3158 }
 0xc0b   :  { %v2167_v57 = vpop.xlane.xlu1 %2166  ;;  %v1951_v12 = vsel %vm285_vm2, %v4029_v11, 0.0 }
 0xc0c   :  { %v2168_v5 = vsub.f32 %v2160_v28, %v2167_v57 }
 0xc0d   :  { %1834 = vrot.lane.b32.xlu1 %v3925_v18, %s3414_s27 }
 0xc0e   :  { %v2169_v18 = vmul.f32 1.442695, %v2168_v5 }
 0xc0f   :  { %v1504_v58 = vpop.permute.xlu1 %1503 }
 0xc10   :  { %v1509_v60 = vsel %vm349_vm3, %v1504_v58, 0  ;;  %3162 = vpow2.f32 %v2169_v18 }
 0xc11   :  { %2920 = vmatpush3.bf16.msra.mxu1 %v1509_v60 }
 0xc12   :  { %2931 = vmatprep.subr.bf16.mxu1 %v3406_v15  ;;  %v4031_v8 = vpop.eup %3160 }
 0xc13   :  { %v2061_v13 = vsel %vm285_vm2, %v4031_v8, 0.0 }
 0xc1a   :  { %v4035_v10 = vpop.eup %3162 }
 0xc1b   :  { %v2171_v26 = vsel %vm285_vm2, %v4035_v10, 0.0 }
 0xc29   :  { %1829 = vadd.xlane.f32.xlu0 %v1828_v9 }
 0xc2d   :  { %1952 = vadd.xlane.f32.xlu0 %v1951_v12 }
 0xc31   :  { %2062 = vadd.xlane.f32.xlu1 %v2061_v13  ;;  %2172 = vadd.xlane.f32.xlu0 %v2171_v26 }
 0xc38   :  { %v2277_v16 = vpop.xlane.xlu0 %2276 }
 0xc39   :  { %v2278_v30 = vsub.f32 %v2270_v45, %v2277_v16 }
 0xc3b   :  { %v2279_v19 = vmul.f32 1.442695, %v2278_v30 }
 0xc3d   :  { %3164 = vpow2.f32 %v2279_v19 }
 0xc40   :  { %v1498_v17 = vpop.xlane.xlu1 %1497 }
 0xc41   :  { %3166 = vrcp.f32 %v1498_v17 }
 0xc42   :  { %2067 = vrot.lane.b32.xlu1 %v3945_v32, %s3408_s25 }
 0xc46   :  { %2177 = vrot.lane.b32.xlu1 %v3945_v32, %s3412_s11 }
 0xc47   :  { %v4045_v20 = vpop.eup %3164 }
 0xc48   :  { %v2281_v21 = vsel %vm285_vm2, %v4045_v20, 0.0 }
 0xc49   :  { %2282 = vadd.xlane.f32.xlu0 %v2281_v21 }
 0xc4a   :  { %2287 = vrot.lane.b32.xlu1 %v3945_v32, %s3414_s27 }
 0xc4b   :  { %v3167_v22 = vpop.eup %3166 }
 0xc4c   :  { %v1500_v23 = vmul.f32 %v3167_v22, %v4008_v48 }
 0xc4e   :  { %v1501_v25 = vpack.c.bf16 %v1500_v23, %v1500_v23 }
 0xc50   :  { %2922 = vmatmul.mubr.msk.bf16.vlgmr.msra.gmra.mrb[44].mxu1 %vm285_vm2, %v1501_v25 }
 0xc51   :  { %2932 = vmatpush3.bf16.msra.mxu1 %v1620_v27  ;;  %2933 = vmatprep.mubr.msk.bf16.mxu1 %vm3407_vm1, %v3406_v15 }
 0xc52   :  { %2943 = vmatprep.subr.bf16.mxu1 %v3406_v15 }
 0xc5f   :  { %1957 = vrot.lane.b32.xlu0 %v3945_v32, %s3409_s1 }
 0xc81   :  { %v1610_v28 = vpop.xlane.xlu0 %1609 }
 0xc82   :  { %3168 = vrcp.f32 %v1610_v28 }
 0xc85   :  { %v1725_v34 = vpop.permute.xlu0 %1724 }
 0xc86   :  { %v1730_v37 = vsel %vm349_vm3, %v1725_v34, 0 }
 0xc89   :  { %v1720_v29 = vpop.xlane.xlu1 %1719 }
 0xc8a   :  { %3170 = vrcp.f32 %v1720_v29  ;;  %v3102_v29 = vld [vmem:[%s4194_s12] sm:$0xff]  }
 0xc8b   :  { %3010 = vmatpush3.bf16.msra.mxu0 %v3102_v29 }
 0xc8c   :  { %v3169_v31 = vpop.eup %3168  ;;  %3011 = vmatprep.subr.bf16.mxu0 %v3406_v15 }
 0xc8d   :  { %v1612_v33 = vmul.f32 %v3169_v31, %v4012_v53  ;;  %v1835_v40 = vpop.permute.xlu1 %1834 }
 0xc8e   :  { %v1840_v42 = vsel %vm349_vm3, %v1835_v40, 0 }
 0xc8f   :  { %v1613_v36 = vpack.c.bf16 %v1612_v33, %v1612_v33 }
 0xc91   :  { %2934 = vmatmul.mubr.msk.bf16.vlgmr.msra.gmra.mrb[48].mxu1 %vm285_vm2, %v1613_v36 }
 0xc92   :  { %2944 = vmatpush3.bf16.msra.mxu1 %v1730_v37  ;;  %2945 = vmatprep.mubr.msk.bf16.mxu1 %vm3407_vm1, %v3406_v15  ;;  %v3103_v37 = vld [vmem:[%s4194_s12 + $0x8] sm:$0xff]  }
 0xc93   :  { %2955 = vmatprep.subr.bf16.mxu1 %v3406_v15  ;;  %3012 = vmatpush3.bf16.msra.mxu0 %v3103_v37 }
 0xc94   :  { %v3171_v32 = vpop.eup %3170  ;;  %3025 = vmatprep.subr.bf16.mxu0 %v3406_v15 }
 0xc95   :  { %v1722_v39 = vmul.f32 %v3171_v32, %v4016_v55 }
 0xc97   :  { %v1723_v41 = vpack.c.bf16 %v1722_v39, %v1722_v39 }
 0xc99   :  { %2946 = vmatmul.mubr.msk.bf16.vlgmr.msra.gmra.mrb[52].mxu1 %vm285_vm2, %v1723_v41 }
 0xc9a   :  { %2956 = vmatpush3.bf16.msra.mxu1 %v1840_v42  ;;  %2957 = vmatprep.mubr.msk.bf16.mxu1 %vm3407_vm1, %v3406_v15 }
 0xc9b   :  { %2967 = vmatprep.subr.bf16.mxu1 %v3406_v15 }
 0xcb6   :  { %v1830_v43 = vpop.xlane.xlu0 %1829 }
 0xcb7   :  { %3172 = vrcp.f32 %v1830_v43 }
 0xcba   :  { %v1953_v44 = vpop.xlane.xlu0 %1952 }
 0xcbb   :  { %3174 = vrcp.f32 %v1953_v44 }
 0xcbe   :  { %v2063_v1 = vpop.xlane.xlu1 %2062  ;;  %v2173_v49 = vpop.xlane.xlu0 %2172 }
 0xcbf   :  { %3176 = vrcp.f32 %v2063_v1 }
 0xcc0   :  { %3178 = vrcp.f32 %v2173_v49 }
 0xcc1   :  { %v3173_v45 = vpop.eup %3172 }
 0xcc2   :  { %v1832_v0 = vmul.f32 %v3173_v45, %v3157_v7  ;;  %v2068_v51 = vpop.permute.xlu1 %2067 }
 0xcc3   :  { %v2073_v47 = vsel %vm349_vm3, %v2068_v51, 0 }
 0xcc4   :  { %v1833_v48 = vpack.c.bf16 %v1832_v0, %v1832_v0 }
 0xcc5   :  { %v3175_v46 = vpop.eup %3174 }
 0xcc6   :  { %2958 = vmatmul.mubr.msk.bf16.vlgmr.msra.gmra.mrb[56].mxu1 %vm285_vm2, %v1833_v48  ;;  %v1955_v52 = vmul.f32 %v3175_v46, %v4029_v11  ;;  %v2178_v58 = vpop.permute.xlu1 %2177 }
 0xcc7   :  { %2969 = vmatprep.mubr.msk.bf16.mxu1 %vm3407_vm1, %v3406_v15  ;;  %v2183_v61 = vsel %vm349_vm3, %v2178_v58, 0 }
 0xcc8   :  { %v1956_v55 = vpack.c.bf16 %v1955_v52, %v1955_v52 }
 0xcc9   :  { %v3177_v56 = vpop.eup %3176 }
 0xcca   :  { %v2065_v57 = vmul.f32 %v3177_v56, %v4031_v8  ;;  %v3179_v60 = vpop.eup %3178  ;;  %v2288_v63 = vpop.permute.xlu1 %2287 }
 0xccb   :  { %v2175_v62 = vmul.f32 %v3179_v60, %v4035_v10  ;;  %v2293_v4 = vsel %vm349_vm3, %v2288_v63, 0 }
 0xccc   :  { %v2066_v59 = vpack.c.bf16 %v2065_v57, %v2065_v57 }
 0xccd   :  { %v2176_v2 = vpack.c.bf16 %v2175_v62, %v2175_v62  ;;  %v2684_v62 = vld [vmem:[#allocation13] ss:$0 sm:$0xff] }
 0xcd6   :  { %v2283_v50 = vpop.xlane.xlu0 %2282 }
 0xcd7   :  { %3180 = vrcp.f32 %v2283_v50 }
 0xcda   :  { %v1958_v54 = vpop.permute.xlu0 %1957 }
 0xcdb   :  { %v1963_v53 = vsel %vm349_vm3, %v1958_v54, 0 }
 0xcdc   :  { %2968 = vmatpush3.bf16.msra.mxu1 %v1963_v53 }
 0xcdd   :  { %2979 = vmatprep.subr.bf16.mxu1 %v3406_v15 }
 0xcdf   :  { %2970 = vmatmul.mubr.msk.bf16.vlgmr.msra.gmra.mrb[60].mxu1 %vm285_vm2, %v1956_v55 }
 0xce0   :  { %2980 = vmatpush3.bf16.msra.mxu1 %v2073_v47  ;;  %2981 = vmatprep.mubr.msk.bf16.mxu1 %vm3407_vm1, %v3406_v15 }
 0xce1   :  { %2991 = vmatprep.subr.bf16.mxu1 %v3406_v15  ;;  %v3181_v3 = vpop.eup %3180 }
 0xce2   :  { %v2285_v5 = vmul.f32 %v3181_v3, %v4045_v20 }
 0xce4   :  { %v2286_v6 = vpack.c.bf16 %v2285_v5, %v2285_v5 }
 0xce7   :  { %2982 = vmatmul.mubr.msk.bf16.vlgmr.msra.gmra.mrb[64].mxu1 %vm285_vm2, %v2066_v59 }
 0xce8   :  { %2992 = vmatpush3.bf16.msra.mxu1 %v2183_v61  ;;  %2993 = vmatprep.mubr.msk.bf16.mxu1 %vm3407_vm1, %v3406_v15 }
 0xce9   :  { %3003 = vmatprep.subr.bf16.mxu1 %v3406_v15 }
 0xcef   :  { %2994 = vmatmul.mubr.msk.bf16.vlgmr.msra.gmra.mrb[68].mxu1 %vm285_vm2, %v2176_v2 }
 0xcf0   :  { %3004 = vmatpush3.bf16.msra.mxu1 %v2293_v4  ;;  %3005 = vmatprep.mubr.msk.bf16.mxu1 %vm3407_vm1, %v3406_v15 }
 0xcf1   :  { %3017 = vmatprep.subr.bf16.mxu1 %v3406_v15 }
 0xcf7   :  { %3006 = vmatmul.mubr.msk.bf16.vlgmr.msra.gmra.mrb[72].mxu1 %vm285_vm2, %v2286_v6 }
 0xcf8   :  { %3021 = vmatprep.mubr.msk.bf16.mxu1 %vm3407_vm1, %v3406_v15 }
 0xd23   :  { %v1545_v18 = vpop.f32.mrb[44].mxu1 }
 0xd24   :  { %v2923_v7 = vpop.f32.mrb[45].mxu1 }
 0xd25   :  { %v1548_v9 = vpop.f32.mrb[46].mxu1 }
 0xd26   :  { %v2924_v11 = vpop.f32.mrb[47].mxu1 }
 0xd64   :  { %v1656_v8 = vpop.f32.mrb[48].mxu1 }
 0xd65   :  { %v2935_v12 = vpop.f32.mrb[49].mxu1 }
 0xd66   :  { %v1659_v10 = vpop.f32.mrb[50].mxu1 }
 0xd67   :  { %v2936_v13 = vpop.f32.mrb[51].mxu1 }
 0xd6c   :  { %v1766_v26 = vpop.f32.mrb[52].mxu1 }
 0xd6d   :  { %v2947_v14 = vpop.f32.mrb[53].mxu1 }
 0xd6e   :  { %v1769_v16 = vpop.f32.mrb[54].mxu1 }
 0xd6f   :  { %v2948_v30 = vpop.f32.mrb[55].mxu1 }
 0xd99   :  { %v1876_v19 = vpop.f32.mrb[56].mxu1 }
 0xd9a   :  { %v2959_v17 = vpop.f32.mrb[57].mxu1 }
 0xd9b   :  { %v1879_v20 = vpop.f32.mrb[58].mxu1  ;;  %v3105_v17 = vld [vmem:[%s4196_s14 + $0x8] sm:$0xff]  }
 0xd9c   :  { %v2960_v21 = vpop.f32.mrb[59].mxu1  ;;  %v3106_v20 = vld [vmem:[%s4198_s16] sm:$0xff]  }
 0xd9d   :  { %v3107_v21 = vld [vmem:[%s4198_s16 + $0x8] sm:$0xff]  }
 0xdb2   :  { %v1999_v22 = vpop.f32.mrb[60].mxu1 }
 0xdb3   :  { %v2971_v23 = vpop.f32.mrb[61].mxu1 }
 0xdb4   :  { %v2002_v25 = vpop.f32.mrb[62].mxu1 }
 0xdb5   :  { %v2972_v27 = vpop.f32.mrb[63].mxu1 }
 0xdba   :  { %v2109_v28 = vpop.f32.mrb[64].mxu1 }
 0xdbb   :  { %v3078_v31 = vpack.i.bf16 %v2109_v28, %v1656_v8  ;;  %v2983_v33 = vpop.f32.mrb[65].mxu1 }
 0xdbc   :  { %v2112_v34 = vpop.f32.mrb[66].mxu1 }
 0xdbd   :  { %3079 = vrot.lane.b32.xlu1 %v3078_v31, %s3419_s9  ;;  %v2984_v36 = vpop.f32.mrb[67].mxu1  ;;  %v2443_v31 = vsub.s32 2, %v3657_v24  ;;  %v3186_v34 = vld [vmem:[%s4200_s18] sm:$0x7]  ;;  %v3108_v24 = vld [vmem:[%s4198_s16 + $0x10] sm:$0xff]  }
 0xdbf   :  { %v2444_v36 = vrot.slane %v3186_v34, %v2443_v31 }
 0xdc2   :  { %v2219_v32 = vpop.f32.mrb[68].mxu1 }
 0xdc3   :  { %v3083_v39 = vpack.i.bf16 %v2219_v32, %v1766_v26  ;;  %v2995_v40 = vpop.f32.mrb[69].mxu1 }
 0xdc4   :  { %v2222_v41 = vpop.f32.mrb[70].mxu1 }
 0xdc5   :  { %3084 = vrot.lane.b32.xlu1 %v3083_v39, %s3420_s29  ;;  %v2996_v42 = vpop.f32.mrb[71].mxu1  ;;  %v3187_v41 = vld [vmem:[%s4201_s19] sm:$0x7] }
 0xdc6   :  { %v2450_v42 = vrot.slane %v3187_v41, %v2443_v31 }
 0xdca   :  { %v2329_v43 = vpop.f32.mrb[72].mxu1 }
 0xdcb   :  { %v3088_v45 = vpack.i.bf16 %v2329_v43, %v1876_v19  ;;  %v3007_v0 = vpop.f32.mrb[73].mxu1  ;;  %v3104_v19 = vld [vmem:[%s4196_s14] sm:$0xff]  }
 0xdcc   :  { %v2332_v48 = vpop.f32.mrb[74].mxu1  ;;  %3018 = vmatpush3.bf16.msra.mxu1 %v3104_v19 }
 0xdcd   :  { %3089 = vrot.lane.b32.xlu1 %v3088_v45, %s3421_s23  ;;  %v3008_v44 = vpop.f32.mrb[75].mxu1  ;;  %3019 = vmatprep.subr.bf16.mxu1 %v3406_v15 }
 0xdce   :  { %v3109_v44 = vld [vmem:[%s4198_s16 + $0x18] sm:$0xff]   ;;  %s3422_s16 = smov [#allocation16]  }
 0xdcf   :  { %s2619_s24 = sshll.u32 %s3422_s16, 4  ;;  %s2620_s24 = int_to_ptr.vmem [resolvable:$true] %s2619_s24 }
 0xdd0   :  { %3020 = vmatpush3.bf16.msra.mxu1 %v3105_v17  ;;  %s3364_s22 = scalar_lea.vmem %s2620_s24, 256  ;;  %p3369_p9 = scmp.lt.s32.totalorder %s2620_s24, %s2620_s24 }
 0xdd1   :  { %p3365_p8 = scmp.ne.s32.totalorder %s2620_s24, %s3364_s22  ;;  %p3370_p10 = scmp.lt.s32.totalorder %s3364_s22, %s3364_s22 }
 0xdd3   :  { %p3371_p11 = por %p3370_p10, %p3369_p9 }
 0xdd5   :  { %p3372_p12 = pnand %p3371_p11, %p3365_p8 }
 0xe2f   :  { %v3080_v1 = vpop.permute.xlu1 %3079 }
 0xe30   :  { %v3082_v46 = vunpack.i.h.bf16 %v3080_v1  ;;  %v3081_v50 = vunpack.i.l.bf16 %v3080_v1  ;;  %v2688_v1 = vld [vmem:[#allocation14] ss:$0 sm:$0xff] }
 0xe32   :  { %v2347_v51 = vsel %vm285_vm2, %v1999_v22, %v3082_v46  ;;  %v1894_v55 = vsel %vm285_vm2, %v1545_v18, %v3081_v50 }
 0xe37   :  { %v3085_v49 = vpop.permute.xlu1 %3084 }
 0xe38   :  { %v3087_v52 = vunpack.i.h.bf16 %v3085_v49  ;;  %v3086_v54 = vunpack.i.l.bf16 %v3085_v49 }
 0xe3a   :  { %v2348_v57 = vsel %vm736_vm4, %v2347_v51, %v3087_v52  ;;  %v1895_v58 = vsel %vm736_vm4, %v1894_v55, %v3086_v54 }
 0xe3f   :  { %v3090_v53 = vpop.permute.xlu1 %3089 }
 0xe40   :  { %v3092_v56 = vunpack.i.h.bf16 %v3090_v53  ;;  %v3091_v47 = vunpack.i.l.bf16 %v3090_v53 }
 0xe42   :  { %v2349_v59 = vsel %vm738_vm5, %v2348_v57, %v3092_v56  ;;  %v1896_v60 = vsel %vm738_vm5, %v1895_v58, %v3091_v47 }
 0xe43   :  { %v2350_v61 = vpack.c.bf16 %v2349_v59, %v1896_v60 }
 0xe45   :  { %3014 = vmatmul.mubr.msk.bf16.vlgmr.msra.gmra.mrb[68].mxu0 %vm168_vm0, %v2350_v61 }
 0xe46   :  { %3033 = vmatprep.mubr.msk.bf16.mxu0 %vm3407_vm1, %v3406_v15  ;;  %3026 = vmatpush3.bf16.msra.mxu0 %v3106_v20 }
 0xe47   :  { %3027 = vmatprep.subr.bf16.mxu0 %v3406_v15 }
 0xe4a   :  { %3028 = vmatpush3.bf16.msra.mxu0 %v3107_v21 }
 0xe4b   :  { %3029 = vmatprep.subr.bf16.mxu0 %v3406_v15 }
 0xe4e   :  { %3030 = vmatpush3.bf16.msra.mxu0 %v3108_v24 }
 0xe4f   :  { %3031 = vmatprep.subr.bf16.mxu0 %v3406_v15  ;;  %v2697_v15 = vld [vmem:[%s4199_s17] ss:$0 sm:$0xff] }
 0xe52   :  { %3032 = vmatpush3.bf16.msra.mxu0 %v3109_v44 }
 0xf18   :  { %v2406_v63 = vpop.f32.mrb[68].mxu0 }
 0xf19   :  { %v2407_v2 = vadd.f32 %v2684_v62, %v2406_v63  ;;  %v3015_v3 = vpop.f32.mrb[69].mxu0 }
 0xf1a   :  { %v2409_v4 = vpop.f32.mrb[70].mxu0 }
 0xf1b   :  { %v4119_v5 = vadd.f32 %v2407_v2, %v3884_v35  ;;  %v2410_v6 = vadd.f32 %v2684_v62, %v2409_v4  ;;  %v3016_v18 = vpop.f32.mrb[71].mxu0 }
 0xf1d   :  { %v4122_v7 = vadd.f32 %v2410_v6, %v3887_v38  ;;  %v2415_v9 = vsel %vm168_vm0, %v4119_v5, 0.0 }
 0xf1e   :  { %2416 = vadd.xlane.f32.xlu0 %v2415_v9 }
 0xf1f   :  { %v2418_v11 = vsel %vm168_vm0, %v4122_v7, 0.0 }
 0xf20   :  { %2419 = vadd.xlane.f32.xlu1 %v2418_v11 }
 0xfab   :  { %v2417_v8 = vpop.xlane.xlu0 %2416 }
 0xfac   :  { %v2421_v12 = vmul.f32 0.03125, %v2417_v8 }
 0xfad   :  { %v2420_v10 = vpop.xlane.xlu1 %2419 }
 0xfae   :  { %v2423_v13 = vsub.f32 %v4119_v5, %v2421_v12  ;;  %v2422_v35 = vmul.f32 0.03125, %v2420_v10 }
 0xfb0   :  { %v2424_v26 = vsub.f32 %v4122_v7, %v2422_v35  ;;  %v2425_v14 = vmul.f32 %v2423_v13, %v2423_v13 }
 0xfb2   :  { %v2427_v38 = vsel %vm168_vm0, %v2425_v14, 0.0  ;;  %v2426_v16 = vmul.f32 %v2424_v26, %v2424_v26 }
 0xfb3   :  { %2428 = vadd.xlane.f32.xlu0 %v2427_v38 }
 0xfb4   :  { %v2430_v30 = vsel %vm168_vm0, %v2426_v16, 0.0 }
 0xfb7   :  { %2431 = vadd.xlane.f32.xlu0 %v2430_v30 }
0x1040   :  { %v2429_v22 = vpop.xlane.xlu0 %2428 }
0x1041   :  { %v2433_v23 = vmul.f32 0.03125, %v2429_v22 }
0x1043   :  { %v2435_v25 = vadd.f32 1e-05, %v2433_v23 }
0x1044   :  { %v2432_v27 = vpop.xlane.xlu0 %2431 }
0x1045   :  { %3182 = vrsqrt.f32 %v2435_v25  ;;  %v2434_v28 = vmul.f32 0.03125, %v2432_v27 }
0x1047   :  { %v2436_v29 = vadd.f32 1e-05, %v2434_v28 }
0x1049   :  { %3184 = vrsqrt.f32 %v2436_v29 }
0x104f   :  { %v3183_v33 = vpop.eup %3182 }
0x1050   :  { %v2439_v37 = vmul.f32 %v3183_v33, %v2423_v13 }
0x1052   :  { %v2445_v39 = vmul.f32 %v2444_v36, %v2439_v37 }
0x1053   :  { %v3185_v32 = vpop.eup %3184 }
0x1054   :  { %v2440_v40 = vmul.f32 %v3185_v32, %v2424_v26  ;;  %v2451_v45 = vadd.f32 %v2450_v42, %v2445_v39 }
0x1056   :  { %v2446_v43 = vmul.f32 %v2444_v36, %v2440_v40 }
0x1058   :  { %v2452_v0 = vadd.f32 %v2450_v42, %v2446_v43 }
0x105a   :  { %v2453_v48 = vpack.c.bf16 %v2452_v0, %v2451_v45 }
0x105c   :  { %3022 = vmatmul.mubr.msk.bf16.vlgmr.msra.gmra.mrb[76].mxu1 %vm168_vm0, %v2453_v48 }
0x112f   :  { %v2514_v49 = vpop.f32.mrb[76].mxu1 }
0x1130   :  { %v2515_v46 = vadd.f32 %v2688_v1, %v2514_v49  ;;  %v3023_v50 = vpop.f32.mrb[77].mxu1 }
0x1131   :  { %v2517_v52 = vpop.f32.mrb[78].mxu1 }
0x1132   :  { %v2518_v54 = vadd.f32 %v2688_v1, %v2517_v52  ;;  %v3024_v53 = vpop.f32.mrb[79].mxu1  ;;  %v2521_v51 = vmax.f32 %v2515_v46, 0.0 }
0x1134   :  { %v2522_v55 = vmax.f32 %v2518_v54, 0.0 }
0x1136   :  { %v2523_v56 = vpack.c.bf16 %v2522_v55, %v2521_v51 }
0x1138   :  { %3034 = vmatmul.mubr.msk.bf16.vlgmr.msra.gmra.mrb[72].mxu0 %vm2556_vm6, %v2523_v56 }
0x120b   :  { %v2594_v47 = vpop.f32.mrb[72].mxu0 }
0x120c   :  { %v2601_v57 = vadd.f32 %v2594_v47, %v4119_v5  ;;  %v3035_v58 = vpop.f32.mrb[73].mxu0 }
0x120d   :  { %v2597_v59 = vpop.f32.mrb[74].mxu0 }
0x120e   :  { %v2610_v60 = vadd.f32 %v2697_v15, %v2601_v57  ;;  %v2602_v61 = vadd.f32 %v2597_v59, %v4122_v7  ;;  %v3036_v62 = vpop.f32.mrb[75].mxu0 }
0x1210   :  { %2612 = vst.msk [vmem:[#allocation16] sm:$0xff] %vm168_vm0, %v2610_v60  ;;  %v2611_v63 = vadd.f32 %v2697_v15, %v2602_v61 }
0x1212   :  { %2613 = vst.msk [vmem:[#allocation16 + $0x8] sm:$0xff] %vm168_vm0, %v2611_v63 }
0x1213   :  { %3375 = shalt.err (!%p3372_p12)
}
0x1214   :  { %s3376_s21 = scalar_lea.hbm %s4202_s20, 256 }
0x1215   :  { %p3377_p13 = scmp.ne.s32.totalorder %s4202_s20, %s3376_s21  ;;  %p3380_p0 = scmp.lt.u32.totalorder %s3376_s21, %s4202_s20 }
0x1217   :  { %p3382_p1 = pnand %p3380_p0, %p3377_p13 }
0x1219   :  { %3385 = shalt.err (!%p3382_p1)
}
0x121a   :  { %s3423_s1 = smov 128  }
0x121b   :  { %2625 = dma.vmem_to_hbm [thread:$0]  %s2620_s24, 256, %s4202_s20, [#allocation4], %s3423_s1, %s3423_s1, %s3419_s9  }
0x121c   :  { %3396 = dma.done.wait [#allocation4], 256  }
0x121d   :  { %3397 = vsyncadd [#allocation4], 4294967040 }
0x121e   :  { %2629 = vsyncpa [#allocation3], 1 }
0x121f   :  { %2630 = vsyncpa [#allocation6], 1 }
0x1220   :  { %2631 = vsyncpa [#allocation9], 1 }
0x1221   :  { %2632 = vsyncpa [#allocation12], 1 }
0x1222   :  { %2633 = vsyncpa [#allocation15], 1 }
0x1223   :  { %2634 = vsyncpa [#allocation4], 1 }

</bundles_post_ra>
